<compile_context>
chip_gen: v6e
topology: v6e:2x2x1
jax: 0.10.0
libtpu: 0.0.40
codegen_flags: <defaults>
</compile_context>

<pallas_src>
import functools

import jax
import jax.numpy as jnp
from jax.experimental import pallas as pl
from jax.experimental.pallas import tpu as pltpu


# ---------------------------------------------------------------------------
# Kernels
# ---------------------------------------------------------------------------

def _epilogue(xs_f32, agg, w1a_ref, w1b_ref, b1_ref,
              wc1_ref, bc1_ref, alpha_ref, wc2_ref, bc2_ref, out_ref):
    """GraphConv epilogue + classifier for one row tile (all f32 on-chip)."""
    # GraphConv: relu(concat([x, agg]) @ W1 + b1) == x @ W1a + agg @ W1b + b1
    h = (jnp.dot(xs_f32, w1a_ref[...], preferred_element_type=jnp.float32)
         + jnp.dot(agg, w1b_ref[...], preferred_element_type=jnp.float32)
         + b1_ref[...])
    h = jnp.maximum(h, 0.0)
    # TODO(synk): dropout is 0 in this config; a dropout>0 path would need pltpu.prng_*.

    # classifier: Linear -> PReLU(per-channel) -> Linear
    z = jnp.dot(h, wc1_ref[...], preferred_element_type=jnp.float32) + bc1_ref[...]
    z = jnp.where(z > 0.0, z, alpha_ref[...] * z)
    out_ref[...] = (jnp.dot(z, wc2_ref[...], preferred_element_type=jnp.float32)
                    + bc2_ref[...]).astype(out_ref.dtype)


def _gcn_v_kernel_resident(adj_ref, x_ref,
                           w1a_ref, w1b_ref, b1_ref,
                           wc1_ref, bc1_ref, alpha_ref,
                           wc2_ref, bc2_ref,
                           out_ref, agg_ref, *, tile_n, tile_k):
    """x (bf16, [NP, Dp]) is fully VMEM-resident; k/i tiles are sliced in-kernel."""
    i = pl.program_id(0)
    k = pl.program_id(1)

    @pl.when(k == 0)
    def _():
        agg_ref[...] = jnp.zeros_like(agg_ref)

    koff = pl.multiple_of(k * tile_k, tile_k)
    agg_ref[...] += jnp.dot(adj_ref[...], x_ref[pl.ds(koff, tile_k), :],
                            preferred_element_type=jnp.float32)

    @pl.when(k == pl.num_programs(1) - 1)
    def _():
        ioff = pl.multiple_of(i * tile_n, tile_n)
        xs = x_ref[pl.ds(ioff, tile_n), :].astype(jnp.float32)
        _epilogue(xs, agg_ref[...], w1a_ref, w1b_ref, b1_ref,
                  wc1_ref, bc1_ref, alpha_ref, wc2_ref, bc2_ref, out_ref)


def _gcn_v_kernel_streamed(adj_ref, xk_ref, xs_ref,
                           w1a_ref, w1b_ref, b1_ref,
                           wc1_ref, bc1_ref, alpha_ref,
                           wc2_ref, bc2_ref,
                           out_ref, agg_ref):
    """x k-tiles and self-feature i-tiles are streamed via BlockSpecs (bf16)."""
    k = pl.program_id(1)

    @pl.when(k == 0)
    def _():
        agg_ref[...] = jnp.zeros_like(agg_ref)

    agg_ref[...] += jnp.dot(adj_ref[...], xk_ref[...],
                            preferred_element_type=jnp.float32)

    @pl.when(k == pl.num_programs(1) - 1)
    def _():
        xs = xs_ref[...].astype(jnp.float32)
        _epilogue(xs, agg_ref[...], w1a_ref, w1b_ref, b1_ref,
                  wc1_ref, bc1_ref, alpha_ref, wc2_ref, bc2_ref, out_ref)


# ---------------------------------------------------------------------------
# Host-side preparation (amortize padding / bf16 cast across forward calls)
# ---------------------------------------------------------------------------

def _rup(v, m):
    return ((v + m - 1) // m) * m


def _pad2(a, rows, cols):
    return jnp.pad(a, ((0, rows - a.shape[0]), (0, cols - a.shape[1])))


def prepare_gcn_v(x, adj, params, *, tile_n=512, tile_k=2048,
                  x_resident_bytes=4 << 20):
    """One-time prep: pad to tile-friendly shapes and cast the streamed
    operands to bf16.  Do this ONCE per (x, adj, params); calling it per
    forward wastes ~3x the kernel's own adj HBM traffic on the cast.

    Generation tuning: v5e/v6e tile_n=512, tile_k=1024-2048; v7x tile_n=1024,
    tile_k=2048 (faster HBM needs bigger per-step DMAs; keep NP/tile_n >= 4
    so the parallel row axis splits across both v7x TensorCores).
    """
    N, D = x.shape
    assert adj.shape == (N, N)
    w1a, w1b, b1, wc1, bc1, alpha, wc2, bc2 = params
    nhid = w1a.shape[1]
    nclass = wc2.shape[1]

    # Lane-friendly padding of the small feature dims (zero pad => same math).
    Dp, Hp, Cp = _rup(D, 128), _rup(nhid, 128), _rup(nclass, 128)

    # Clamp tiles to the problem and keep tile_k a multiple of tile_n so
    # NP = round_up(N, tile_k) — no lcm-style over-padding of adj.
    tile_k = max(128, min(_rup(tile_k, 128), _rup(N, 128)))
    tile_n = max(8, min(_rup(tile_n, 8), tile_k))
    if tile_k % tile_n != 0:
        tile_k = _rup(tile_k, tile_n)
    NP = _rup(N, tile_k)

    adj_p = _pad2(adj, NP, NP).astype(jnp.bfloat16)   # dominant HBM stream, bf16
    x_p = _pad2(x, NP, Dp).astype(jnp.bfloat16)       # single bf16 copy (no f32 dup)

    w1a_p = _pad2(w1a, Dp, Hp)
    w1b_p = _pad2(w1b, Dp, Hp)
    b1_p = _pad2(b1, 1, Hp)
    wc1_p = _pad2(wc1, Hp, Hp)
    bc1_p = _pad2(bc1, 1, Hp)
    alpha_p = _pad2(alpha, 1, Hp)
    wc2_p = _pad2(wc2, Hp, Cp)
    bc2_p = _pad2(bc2, 1, Cp)

    x_resident = (NP * Dp * 2) <= x_resident_bytes
    meta = dict(N=N, nclass=nclass, NP=NP, Dp=Dp, Hp=Hp, Cp=Cp,
                tile_n=tile_n, tile_k=tile_k, x_resident=x_resident)
    arrays = (adj_p, x_p, w1a_p, w1b_p, b1_p, wc1_p, bc1_p, alpha_p, wc2_p, bc2_p)
    return meta, arrays


def gcn_v_forward_prepared(meta, arrays, *, vmem_limit_bytes=None,
                           adj_buffers=None):
    """Run the fused forward on prepared (padded / bf16) operands.

    adj_buffers: optional pipeline depth (e.g. 3) for the streamed adj / x
    BlockSpecs — useful on v5e/v6e where VMEM headroom is large and the k=0
    refill of the next row tile is exposed.  None keeps default double-buffer.
    """
    (adj_p, x_p, w1a_p, w1b_p, b1_p,
     wc1_p, bc1_p, alpha_p, wc2_p, bc2_p) = arrays
    N, nclass = meta["N"], meta["nclass"]
    NP, Dp, Hp, Cp = meta["NP"], meta["Dp"], meta["Hp"], meta["Cp"]
    tile_n, tile_k = meta["tile_n"], meta["tile_k"]

    grid = (NP // tile_n, NP // tile_k)
    const = lambda i, k: (0, 0)

    def maybe_buffered(block_shape, index_map):
        if adj_buffers is None:
            return pl.BlockSpec(block_shape, index_map)
        return pl.BlockSpec(block_shape, index_map,
                            pipeline_mode=pl.Buffered(adj_buffers))

    adj_spec = maybe_buffered((tile_n, tile_k), lambda i, k: (i, k))
    weight_specs = [
        pl.BlockSpec((Dp, Hp), const),   # W1[:D]
        pl.BlockSpec((Dp, Hp), const),   # W1[D:]
        pl.BlockSpec((1, Hp), const),    # b1
        pl.BlockSpec((Hp, Hp), const),   # classifier W0
        pl.BlockSpec((1, Hp), const),    # classifier b0
        pl.BlockSpec((1, Hp), const),    # PReLU alpha
        pl.BlockSpec((Hp, Cp), const),   # classifier W2 (lane-padded)
        pl.BlockSpec((1, Cp), const),    # classifier b2 (lane-padded)
    ]

    if meta["x_resident"]:
        # x kept fully in VMEM (constant block index); no re-streaming per row tile.
        kernel = functools.partial(_gcn_v_kernel_resident,
                                   tile_n=tile_n, tile_k=tile_k)
        in_specs = [adj_spec, pl.BlockSpec((NP, Dp), const)] + weight_specs
        operands = (adj_p, x_p,
                    w1a_p, w1b_p, b1_p, wc1_p, bc1_p, alpha_p, wc2_p, bc2_p)
    else:
        # Streamed x: k-tile for aggregation + i-tile of self features (same array).
        kernel = _gcn_v_kernel_streamed
        in_specs = [adj_spec,
                    maybe_buffered((tile_k, Dp), lambda i, k: (k, 0)),
                    pl.BlockSpec((tile_n, Dp), lambda i, k: (i, 0))] + weight_specs
        operands = (adj_p, x_p, x_p,
                    w1a_p, w1b_p, b1_p, wc1_p, bc1_p, alpha_p, wc2_p, bc2_p)

    pred2d = pl.pallas_call(
        kernel,
        out_shape=jax.ShapeDtypeStruct((NP, Cp), jnp.float32),
        grid_spec=pltpu.PrefetchScalarGridSpec(
            num_scalar_prefetch=0,
            grid=grid,
            in_specs=in_specs,
            out_specs=pl.BlockSpec((tile_n, Cp), lambda i, k: (i, 0)),
            scratch_shapes=[pltpu.VMEM((tile_n, Dp), jnp.float32)],   # agg accumulator
        ),
        compiler_params=pltpu.CompilerParams(
            dimension_semantics=("parallel", "arbitrary"),
            vmem_limit_bytes=vmem_limit_bytes),
    )(*operands)

    # Drop row/class padding, then flatten exactly like torch's .view(-1).
    return pred2d[:N, :nclass].reshape(-1)


def gcn_v_forward(x, adj, params, *, vmem_limit_bytes=None, adj_buffers=None,
                  **prep_kwargs):
    """Convenience one-shot wrapper.  For repeated calls with the same adj,
    call prepare_gcn_v once and reuse its result with gcn_v_forward_prepared."""
    meta, arrays = prepare_gcn_v(x, adj, params, **prep_kwargs)
    return gcn_v_forward_prepared(meta, arrays,
                                  vmem_limit_bytes=vmem_limit_bytes,
                                  adj_buffers=adj_buffers)


# ---------------------------------------------------------------------------
# Parameters + pure-JAX reference
# ---------------------------------------------------------------------------

def make_params(key, feature_dim, nhid, nclass):
    ks = jax.random.split(key, 4)

    def xavier(k, shape):
        fan_in, fan_out = shape
        lim = (6.0 / (fan_in + fan_out)) ** 0.5
        return jax.random.uniform(k, shape, jnp.float32, -lim, lim)

    w1 = xavier(ks[0], (2 * feature_dim, nhid))        # GraphConv weight [2D, nhid]
    w1a, w1b = w1[:feature_dim], w1[feature_dim:]
    b1 = jnp.zeros((1, nhid), jnp.float32)
    wc1 = xavier(ks[1], (nhid, nhid))
    bc1 = jax.random.uniform(ks[2], (1, nhid), jnp.float32, -0.1, 0.1)
    alpha = jnp.full((1, nhid), 0.25, jnp.float32)     # PReLU default init
    wc2 = xavier(ks[3], (nhid, nclass))
    bc2 = jnp.zeros((1, nclass), jnp.float32)
    return (w1a, w1b, b1, wc1, bc1, alpha, wc2, bc2)


def gcn_v_reference(x, adj, params):
    w1a, w1b, b1, wc1, bc1, alpha, wc2, bc2 = params
    hp = jax.lax.Precision.HIGHEST
    agg = jnp.dot(adj, x, precision=hp)
    h = jnp.maximum(jnp.dot(x, w1a, precision=hp)
                    + jnp.dot(agg, w1b, precision=hp) + b1, 0.0)
    z = jnp.dot(h, wc1, precision=hp) + bc1
    z = jnp.where(z > 0, z, alpha * z)
    return (jnp.dot(z, wc2, precision=hp) + bc2).reshape(-1)


# ---------------------------------------------------------------------------
# Demo / self-test
# ---------------------------------------------------------------------------

if __name__ == "__main__":
    # Small demo shapes; N intentionally not a multiple of the tiles to exercise padding.
    N, D, nhid, nclass = 384, 48, 40, 1
    key = jax.random.PRNGKey(0)
    kx, ka, kp = jax.random.split(key, 3)

    x = jax.random.normal(kx, (N, D), jnp.float32)
    # random sparse-ish adjacency, row-normalized (MeanAggregator assumption)
    raw = (jax.random.uniform(ka, (N, N)) < 0.1).astype(jnp.float32)
    raw = raw + jnp.eye(N, dtype=jnp.float32)
    adj = raw / jnp.sum(raw, axis=1, keepdims=True)

    params = make_params(kp, D, nhid, nclass)
    ref = gcn_v_reference(x, adj, params)

    # Path 1: production defaults (tiles clamp to this small problem; x resident).
    meta, arrays = prepare_gcn_v(x, adj, params)          # amortizable prep
    pred = jax.block_until_ready(gcn_v_forward_prepared(meta, arrays))
    assert pred.shape == (N * nclass,)
    err = float(jnp.max(jnp.abs(pred - ref)))
    # bf16-streamed adj/x with f32 accumulation: small, bounded deviation vs f32 ref.
    assert jnp.allclose(pred, ref, atol=5e-2, rtol=5e-2), err

    # Path 2: streamed-x / multi-tile path.  Tiny tiles here are purely to
    # exercise the k-accumulation and multiple row tiles — NOT a perf config.
    meta2, arrays2 = prepare_gcn_v(x, adj, params, tile_n=128, tile_k=256,
                                   x_resident_bytes=0)
    pred2 = jax.block_until_ready(gcn_v_forward_prepared(meta2, arrays2))
    err2 = float(jnp.max(jnp.abs(pred2 - ref)))
    assert jnp.allclose(pred2, ref, atol=5e-2, rtol=5e-2), err2

    print("KERNEL_OK")
</pallas_src>

<mosaic_0001>
module attributes {stable_mosaic.version = 11 : i64} {
  func.func @_gcn_v_kernel_resident(%arg0: i32, %arg1: i32, %arg2: memref<384x384xbf16, #tpu.memory_space<vmem>>, %arg3: memref<384x128xbf16, #tpu.memory_space<vmem>>, %arg4: memref<128x128xf32, #tpu.memory_space<vmem>>, %arg5: memref<128x128xf32, #tpu.memory_space<vmem>>, %arg6: memref<1x128xf32, #tpu.memory_space<vmem>>, %arg7: memref<128x128xf32, #tpu.memory_space<vmem>>, %arg8: memref<1x128xf32, #tpu.memory_space<vmem>>, %arg9: memref<1x128xf32, #tpu.memory_space<vmem>>, %arg10: memref<128x128xf32, #tpu.memory_space<vmem>>, %arg11: memref<1x128xf32, #tpu.memory_space<vmem>>, %arg12: memref<384x128xf32, #tpu.memory_space<vmem>>, %arg13: memref<384x128xf32, #tpu.memory_space<vmem>>) attributes {dimension_semantics = [#tpu.dimension_semantics<parallel>, #tpu.dimension_semantics<arbitrary>], iteration_bounds = array<i64: 1, 1>, scalar_prefetch = 0 : i64, scratch_operands = 1 : i64, tpu.core_type = #tpu.core_type<tc>, window_params = [{transform_indices = @transform_0, window_bounds = array<i64: 384, 384>}, {pipeline_mode = #tpu.pipeline_mode<synchronous>, transform_indices = @transform_1, window_bounds = array<i64: 384, 128>}, {pipeline_mode = #tpu.pipeline_mode<synchronous>, transform_indices = @transform_2, window_bounds = array<i64: 128, 128>}, {pipeline_mode = #tpu.pipeline_mode<synchronous>, transform_indices = @transform_3, window_bounds = array<i64: 128, 128>}, {pipeline_mode = #tpu.pipeline_mode<synchronous>, transform_indices = @transform_4, window_bounds = array<i64: 1, 128>}, {pipeline_mode = #tpu.pipeline_mode<synchronous>, transform_indices = @transform_5, window_bounds = array<i64: 128, 128>}, {pipeline_mode = #tpu.pipeline_mode<synchronous>, transform_indices = @transform_6, window_bounds = array<i64: 1, 128>}, {pipeline_mode = #tpu.pipeline_mode<synchronous>, transform_indices = @transform_7, window_bounds = array<i64: 1, 128>}, {pipeline_mode = #tpu.pipeline_mode<synchronous>, transform_indices = @transform_8, window_bounds = array<i64: 128, 128>}, {pipeline_mode = #tpu.pipeline_mode<synchronous>, transform_indices = @transform_9, window_bounds = array<i64: 1, 128>}, {transform_indices = @transform_10, window_bounds = array<i64: 384, 128>}]} {
    %c0_i32 = arith.constant 0 : i32
    %0 = arith.cmpi eq, %arg1, %c0_i32 : i32
    %1 = arith.extui %0 : i1 to i32
    %c0_i32_0 = arith.constant 0 : i32
    %2 = arith.cmpi ne, %1, %c0_i32_0 : i32
    scf.if %2 {
      %cst_9 = arith.constant 0.000000e+00 : f32
      %15 = vector.broadcast %cst_9 : f32 to vector<384x128xf32>
      %c0_10 = arith.constant 0 : index
      %c0_11 = arith.constant 0 : index
      %16 = vector.load %arg13[%c0_10, %c0_11] : memref<384x128xf32, #tpu.memory_space<vmem>>, vector<384x128xf32>
      tpu.vector_store %arg13[%c0_10, %c0_11], %15 {strides = array<i32>} : memref<384x128xf32, #tpu.memory_space<vmem>>, vector<384x128xf32>,
    } else {
    }
    %c384_i32 = arith.constant 384 : i32
    %3 = arith.muli %arg1, %c384_i32 : i32
    %4 = tpu.assume_multiple %3, 384 : i32
    %c0 = arith.constant 0 : index
    %c0_1 = arith.constant 0 : index
    %5 = vector.load %arg13[%c0, %c0_1] : memref<384x128xf32, #tpu.memory_space<vmem>>, vector<384x128xf32>
    %c0_2 = arith.constant 0 : index
    %c0_3 = arith.constant 0 : index
    %6 = vector.load %arg2[%c0_2, %c0_3] : memref<384x384xbf16, #tpu.memory_space<vmem>>, vector<384x384xbf16>
    %7 = arith.index_cast %4 : i32 to index
    %c0_4 = arith.constant 0 : index
    %8 = vector.load %arg3[%7, %c0_4] : memref<384x128xbf16, #tpu.memory_space<vmem>>, vector<384x128xbf16>
    %cst = arith.constant dense<0.000000e+00> : vector<384x128xf32>
    %9 = tpu.matmul %6, %8, %cst {dimension_numbers = #tpu.dot_dimension_numbers<[1], [0], [0], [1], [0, 0, 1, 1], [], []>} : vector<384x384xbf16>, vector<384x128xbf16>, vector<384x128xf32> -> vector<384x128xf32>
    %10 = arith.addf %5, %9 : vector<384x128xf32>
    %c0_5 = arith.constant 0 : index
    %c0_6 = arith.constant 0 : index
    %11 = vector.load %arg13[%c0_5, %c0_6] : memref<384x128xf32, #tpu.memory_space<vmem>>, vector<384x128xf32>
    tpu.vector_store %arg13[%c0_5, %c0_6], %10 {strides = array<i32>} : memref<384x128xf32, #tpu.memory_space<vmem>>, vector<384x128xf32>,
    %c0_i32_7 = arith.constant 0 : i32
    %12 = arith.cmpi eq, %arg1, %c0_i32_7 : i32
    %13 = arith.extui %12 : i1 to i32
    %c0_i32_8 = arith.constant 0 : i32
    %14 = arith.cmpi ne, %13, %c0_i32_8 : i32
    scf.if %14 {
      %c384_i32_9 = arith.constant 384 : i32
      %15 = arith.muli %arg0, %c384_i32_9 : i32
      %16 = tpu.assume_multiple %15, 384 : i32
      %17 = arith.index_cast %16 : i32 to index
      %c0_10 = arith.constant 0 : index
      %18 = vector.load %arg3[%17, %c0_10] : memref<384x128xbf16, #tpu.memory_space<vmem>>, vector<384x128xbf16>
      %19 = arith.extf %18 : vector<384x128xbf16> to vector<384x128xf32>
      %c0_11 = arith.constant 0 : index
      %c0_12 = arith.constant 0 : index
      %20 = vector.load %arg13[%c0_11, %c0_12] : memref<384x128xf32, #tpu.memory_space<vmem>>, vector<384x128xf32>
      %c0_13 = arith.constant 0 : index
      %c0_14 = arith.constant 0 : index
      %21 = vector.load %arg4[%c0_13, %c0_14] : memref<128x128xf32, #tpu.memory_space<vmem>>, vector<128x128xf32>
      %cst_15 = arith.constant dense<0.000000e+00> : vector<384x128xf32>
      %22 = tpu.matmul %19, %21, %cst_15 {dimension_numbers = #tpu.dot_dimension_numbers<[1], [0], [0], [1], [0, 0, 1, 1], [], []>} : vector<384x128xf32>, vector<128x128xf32>, vector<384x128xf32> -> vector<384x128xf32>
      %c0_16 = arith.constant 0 : index
      %c0_17 = arith.constant 0 : index
      %23 = vector.load %arg5[%c0_16, %c0_17] : memref<128x128xf32, #tpu.memory_space<vmem>>, vector<128x128xf32>
      %cst_18 = arith.constant dense<0.000000e+00> : vector<384x128xf32>
      %24 = tpu.matmul %20, %23, %cst_18 {dimension_numbers = #tpu.dot_dimension_numbers<[1], [0], [0], [1], [0, 0, 1, 1], [], []>} : vector<384x128xf32>, vector<128x128xf32>, vector<384x128xf32> -> vector<384x128xf32>
      %25 = arith.addf %22, %24 : vector<384x128xf32>
      %c0_19 = arith.constant 0 : index
      %c0_20 = arith.constant 0 : index
      %26 = vector.load %arg6[%c0_19, %c0_20] : memref<1x128xf32, #tpu.memory_space<vmem>>, vector<1x128xf32>
      %27 = vector.broadcast %26 : vector<1x128xf32> to vector<384x128xf32>
      %28 = arith.addf %25, %27 : vector<384x128xf32>
      %cst_21 = arith.constant 0.000000e+00 : f32
      %29 = vector.broadcast %cst_21 : f32 to vector<384x128xf32>
      %30 = arith.maximumf %28, %29 : vector<384x128xf32>
      %c0_22 = arith.constant 0 : index
      %c0_23 = arith.constant 0 : index
      %31 = vector.load %arg7[%c0_22, %c0_23] : memref<128x128xf32, #tpu.memory_space<vmem>>, vector<128x128xf32>
      %cst_24 = arith.constant dense<0.000000e+00> : vector<384x128xf32>
      %32 = tpu.matmul %30, %31, %cst_24 {dimension_numbers = #tpu.dot_dimension_numbers<[1], [0], [0], [1], [0, 0, 1, 1], [], []>} : vector<384x128xf32>, vector<128x128xf32>, vector<384x128xf32> -> vector<384x128xf32>
      %c0_25 = arith.constant 0 : index
      %c0_26 = arith.constant 0 : index
      %33 = vector.load %arg8[%c0_25, %c0_26] : memref<1x128xf32, #tpu.memory_space<vmem>>, vector<1x128xf32>
      %34 = vector.broadcast %33 : vector<1x128xf32> to vector<384x128xf32>
      %35 = arith.addf %32, %34 : vector<384x128xf32>
      %cst_27 = arith.constant 0.000000e+00 : f32
      %36 = vector.broadcast %cst_27 : f32 to vector<384x128xf32>
      %37 = arith.cmpf ogt, %35, %36 : vector<384x128xf32>
      %c0_28 = arith.constant 0 : index
      %c0_29 = arith.constant 0 : index
      %38 = vector.load %arg9[%c0_28, %c0_29] : memref<1x128xf32, #tpu.memory_space<vmem>>, vector<1x128xf32>
      %39 = vector.broadcast %38 : vector<1x128xf32> to vector<384x128xf32>
      %40 = arith.mulf %39, %35 : vector<384x128xf32>
      %41 = arith.select %37, %35, %40 : vector<384x128xi1>, vector<384x128xf32>
      %c0_30 = arith.constant 0 : index
      %c0_31 = arith.constant 0 : index
      %42 = vector.load %arg10[%c0_30, %c0_31] : memref<128x128xf32, #tpu.memory_space<vmem>>, vector<128x128xf32>
      %cst_32 = arith.constant dense<0.000000e+00> : vector<384x128xf32>
      %43 = tpu.matmul %41, %42, %cst_32 {dimension_numbers = #tpu.dot_dimension_numbers<[1], [0], [0], [1], [0, 0, 1, 1], [], []>} : vector<384x128xf32>, vector<128x128xf32>, vector<384x128xf32> -> vector<384x128xf32>
      %c0_33 = arith.constant 0 : index
      %c0_34 = arith.constant 0 : index
      %44 = vector.load %arg11[%c0_33, %c0_34] : memref<1x128xf32, #tpu.memory_space<vmem>>, vector<1x128xf32>
      %45 = vector.broadcast %44 : vector<1x128xf32> to vector<384x128xf32>
      %46 = arith.addf %43, %45 : vector<384x128xf32>
      %c0_35 = arith.constant 0 : index
      %c0_36 = arith.constant 0 : index
      %47 = vector.load %arg12[%c0_35, %c0_36] : memref<384x128xf32, #tpu.memory_space<vmem>>, vector<384x128xf32>
      tpu.vector_store %arg12[%c0_35, %c0_36], %46 {strides = array<i32>} : memref<384x128xf32, #tpu.memory_space<vmem>>, vector<384x128xf32>,
    } else {
    }
    return
  }
  func.func @transform_0(%arg0: i32, %arg1: i32) -> (i32, i32) {
    %c0_i32 = arith.constant 0 : i32
    return %arg0, %arg1 : i32, i32
  }
  func.func @transform_1(%arg0: i32, %arg1: i32) -> (i32, i32) {
    %c0_i32 = arith.constant 0 : i32
    %c0_i32_0 = arith.constant 0 : i32
    %c0_i32_1 = arith.constant 0 : i32
    return %c0_i32, %c0_i32_0 : i32, i32
  }
  func.func @transform_2(%arg0: i32, %arg1: i32) -> (i32, i32) {
    %c0_i32 = arith.constant 0 : i32
    %c0_i32_0 = arith.constant 0 : i32
    %c0_i32_1 = arith.constant 0 : i32
    return %c0_i32, %c0_i32_0 : i32, i32
  }
  func.func @transform_3(%arg0: i32, %arg1: i32) -> (i32, i32) {
    %c0_i32 = arith.constant 0 : i32
    %c0_i32_0 = arith.constant 0 : i32
    %c0_i32_1 = arith.constant 0 : i32
    return %c0_i32, %c0_i32_0 : i32, i32
  }
  func.func @transform_4(%arg0: i32, %arg1: i32) -> (i32, i32) {
    %c0_i32 = arith.constant 0 : i32
    %c0_i32_0 = arith.constant 0 : i32
    %c0_i32_1 = arith.constant 0 : i32
    return %c0_i32, %c0_i32_0 : i32, i32
  }
  func.func @transform_5(%arg0: i32, %arg1: i32) -> (i32, i32) {
    %c0_i32 = arith.constant 0 : i32
    %c0_i32_0 = arith.constant 0 : i32
    %c0_i32_1 = arith.constant 0 : i32
    return %c0_i32, %c0_i32_0 : i32, i32
  }
  func.func @transform_6(%arg0: i32, %arg1: i32) -> (i32, i32) {
    %c0_i32 = arith.constant 0 : i32
    %c0_i32_0 = arith.constant 0 : i32
    %c0_i32_1 = arith.constant 0 : i32
    return %c0_i32, %c0_i32_0 : i32, i32
  }
  func.func @transform_7(%arg0: i32, %arg1: i32) -> (i32, i32) {
    %c0_i32 = arith.constant 0 : i32
    %c0_i32_0 = arith.constant 0 : i32
    %c0_i32_1 = arith.constant 0 : i32
    return %c0_i32, %c0_i32_0 : i32, i32
  }
  func.func @transform_8(%arg0: i32, %arg1: i32) -> (i32, i32) {
    %c0_i32 = arith.constant 0 : i32
    %c0_i32_0 = arith.constant 0 : i32
    %c0_i32_1 = arith.constant 0 : i32
    return %c0_i32, %c0_i32_0 : i32, i32
  }
  func.func @transform_9(%arg0: i32, %arg1: i32) -> (i32, i32) {
    %c0_i32 = arith.constant 0 : i32
    %c0_i32_0 = arith.constant 0 : i32
    %c0_i32_1 = arith.constant 0 : i32
    return %c0_i32, %c0_i32_0 : i32, i32
  }
  func.func @transform_10(%arg0: i32, %arg1: i32) -> (i32, i32) {
    %c0_i32 = arith.constant 0 : i32
    %c0_i32_0 = arith.constant 0 : i32
    return %arg0, %c0_i32 : i32, i32
  }
}

</mosaic_0001>

<bundles_post_ra>
// kernel: tpu_custom_call.1
= control target key start
LH: loop header
LB: loop body
LE: loop exit
PB: predicated region body
PF: predicated region fallthrough
CT: control target
= control target key end

     0   :  { %15 = vsyncpa [#allocation4], 0  ;;  %s5217_s0 = inlined_call_operand.hbm [shape: bf16[384,384], index: 0, kind: input, shape index: {}]   ;;  %s5218_s1 = inlined_call_operand.hbm [shape: bf16[384,128], index: 1, kind: input, shape index: {}]   ;;  %s5219_s2 = inlined_call_operand.hbm [shape: f32[128,128], index: 2, kind: input, shape index: {}]   ;;  %s5220_s3 = inlined_call_operand.hbm [shape: f32[128,128], index: 3, kind: input, shape index: {}]   ;;  %s5221_s4 = inlined_call_operand.vmem [shape: f32[1,128], index: 4, kind: input, shape index: {}]   ;;  %s5222_s5 = inlined_call_operand.hbm [shape: f32[128,128], index: 5, kind: input, shape index: {}]   ;;  %s5223_s6 = inlined_call_operand.vmem [shape: f32[1,128], index: 6, kind: input, shape index: {}]   ;;  %s5224_s7 = inlined_call_operand.vmem [shape: f32[1,128], index: 7, kind: input, shape index: {}]   ;;  %s5225_s8 = inlined_call_operand.hbm [shape: f32[128,128], index: 8, kind: input, shape index: {}]   ;;  %s5226_s9 = inlined_call_operand.vmem [shape: f32[1,128], index: 9, kind: input, shape index: {}]   ;;  %s5227_s10 = inlined_call_operand.hbm [shape: f32[384,128], index: 10, kind: output, shape index: {}]  }
   0x1   :  { %16 = vsyncpa [#allocation7], 0 }
   0x2   :  { %17 = vsyncpa [#allocation10], 0 }
   0x3   :  { %18 = vsyncpa [#allocation13], 0 }
   0x4   :  { %19 = vsyncpa [#allocation5], 0  ;;  %s4505_s13 = smov [#allocation6]  }
   0x5   :  { %s37_s14 = sshll.u32 %s4505_s13, 4  ;;  %s38_s14 = int_to_ptr.vmem [resolvable:$true] %s37_s14 }
   0x6   :  { %s4363_s15 = scalar_lea.vmem %s38_s14, 3072  ;;  %p4368_p1 = scmp.lt.s32.totalorder %s38_s14, %s38_s14 }
   0x7   :  { %p4364_p0 = scmp.ne.s32.totalorder %s38_s14, %s4363_s15  ;;  %p4369_p2 = scmp.lt.s32.totalorder %s4363_s15, %s4363_s15 }
   0x9   :  { %p4370_p3 = por %p4369_p2, %p4368_p1 }
   0xb   :  { %p4371_p4 = pnand %p4370_p3, %p4364_p0 }
   0xd   :  { %4374 = shalt.err (!%p4371_p4)
}
   0xe   :  { %s4506_s16 = smov 64   ;;  %s4507_s17 = smov 4  }
   0xf   :  { %43 = dma.hbm_to_vmem [thread:$0]  %s5218_s1, 3072, %s38_s14, [#allocation7], %s4506_s16, %s4506_s16, %s4507_s17  }
  0x10   :  { %s4508_s20 = smov [#allocation9]   ;;  %s4509_s22 = smov [#allocation3]  }
  0x11   :  { %s61_s21 = sshll.u32 %s4508_s20, 4  ;;  %s25_s23 = sshll.u32 %s4509_s22, 4  ;;  %s62_s21 = int_to_ptr.vmem [resolvable:$true] %s61_s21  ;;  %s26_s23 = int_to_ptr.vmem [resolvable:$true] %s25_s23 }
  0x12   :  { %s4383_s24 = scalar_lea.vmem %s62_s21, 2048  ;;  %p4388_p6 = scmp.lt.s32.totalorder %s62_s21, %s62_s21 }
  0x13   :  { %p4384_p5 = scmp.ne.s32.totalorder %s62_s21, %s4383_s24  ;;  %p4389_p7 = scmp.lt.s32.totalorder %s4383_s24, %s4383_s24 }
  0x15   :  { %p4390_p8 = por %p4389_p7, %p4388_p6 }
  0x17   :  { %p4391_p9 = pnand %p4390_p8, %p4384_p5 }
  0x19   :  { %4394 = shalt.err (!%p4391_p9)
}
  0x1a   :  { %s4510_s25 = smov 128   ;;  %s4511_s26 = smov 8  }
  0x1b   :  { %67 = dma.hbm_to_vmem [thread:$0]  %s5220_s3, 2048, %s62_s21, [#allocation10], %s4510_s25, %s4510_s25, %s4511_s26  }
  0x1c   :  { %s4403_s1 = scalar_lea.vmem %s26_s23, 9216  ;;  %p4408_p11 = scmp.lt.s32.totalorder %s26_s23, %s26_s23 }
  0x1d   :  { %p4404_p10 = scmp.ne.s32.totalorder %s26_s23, %s4403_s1  ;;  %p4409_p12 = scmp.lt.s32.totalorder %s4403_s1, %s4403_s1 }
  0x1f   :  { %p4410_p13 = por %p4409_p12, %p4408_p11 }
  0x21   :  { %p4411_p0 = pnand %p4410_p13, %p4404_p10 }
  0x23   :  { %4414 = shalt.err (!%p4411_p0)
}
  0x24   :  { %s4512_s29 = smov 192   ;;  %s4513_s30 = smov 12  }
  0x25   :  { %31 = dma.hbm_to_vmem [thread:$0]  %s5217_s0, 9216, %s26_s23, [#allocation4], %s4512_s29, %s4512_s29, %s4513_s30  }
  0x26   :  { %s4514_s13 = smov [#allocation8]   ;;  %s4515_s15 = smov [#allocation11]  }
  0x27   :  { %s49_s14 = sshll.u32 %s4514_s13, 4  ;;  %s75_s16 = sshll.u32 %s4515_s15, 4  ;;  %s50_s14 = int_to_ptr.vmem [resolvable:$true] %s49_s14  ;;  %s76_s16 = int_to_ptr.vmem [resolvable:$true] %s75_s16 }
  0x28   :  { %s4423_s3 = scalar_lea.vmem %s50_s14, 2048  ;;  %p4428_p2 = scmp.lt.s32.totalorder %s50_s14, %s50_s14 }
  0x29   :  { %p4424_p1 = scmp.ne.s32.totalorder %s50_s14, %s4423_s3  ;;  %p4429_p3 = scmp.lt.s32.totalorder %s4423_s3, %s4423_s3 }
  0x2b   :  { %p4430_p4 = por %p4429_p3, %p4428_p2 }
  0x2d   :  { %p4431_p5 = pnand %p4430_p4, %p4424_p1 }
  0x2f   :  { %4434 = shalt.err (!%p4431_p5)
}
  0x30   :  { %55 = dma.hbm_to_vmem [thread:$0]  %s5219_s2, 2048, %s50_s14, [#allocation7], %s4510_s25, %s4510_s25, %s4511_s26  }
  0x31   :  { %s4443_s0 = scalar_lea.vmem %s76_s16, 2048  ;;  %p4448_p7 = scmp.lt.s32.totalorder %s76_s16, %s76_s16 }
  0x32   :  { %p4444_p6 = scmp.ne.s32.totalorder %s76_s16, %s4443_s0  ;;  %p4449_p8 = scmp.lt.s32.totalorder %s4443_s0, %s4443_s0 }
  0x34   :  { %p4450_p9 = por %p4449_p8, %p4448_p7 }
  0x36   :  { %p4451_p10 = pnand %p4450_p9, %p4444_p6 }
  0x38   :  { %4454 = shalt.err (!%p4451_p10)
}
  0x39   :  { %81 = dma.hbm_to_vmem [thread:$0]  %s5222_s5, 2048, %s76_s16, [#allocation10], %s4510_s25, %s4510_s25, %s4511_s26  }
  0x3a   :  { %s4516_s21 = smov [#allocation12]  }
  0x3b   :  { %s91_s22 = sshll.u32 %s4516_s21, 4  ;;  %s92_s22 = int_to_ptr.vmem [resolvable:$true] %s91_s22 }
  0x3c   :  { %s4463_s23 = scalar_lea.vmem %s92_s22, 2048  ;;  %p4468_p12 = scmp.lt.s32.totalorder %s92_s22, %s92_s22 }
  0x3d   :  { %p4464_p11 = scmp.ne.s32.totalorder %s92_s22, %s4463_s23  ;;  %p4469_p13 = scmp.lt.s32.totalorder %s4463_s23, %s4463_s23 }
  0x3f   :  { %p4470_p0 = por %p4469_p13, %p4468_p12 }
  0x41   :  { %p4471_p1 = pnand %p4470_p0, %p4464_p11 }
  0x43   :  { %4474 = shalt.err (!%p4471_p1)
}
  0x44   :  { %97 = dma.hbm_to_vmem [thread:$0]  %s5225_s8, 2048, %s92_s22, [#allocation13], %s4510_s25, %s4510_s25, %s4511_s26  }
  0x45   :  { %4495 = dma.done.wait [#allocation4], 9216  }
  0x46   :  { %4496 = vsyncadd [#allocation4], 4294958080 }
  0x47   :  { %4497 = dma.done.wait [#allocation7], 5120  }
  0x48   :  { %4498 = vsyncadd [#allocation7], 4294962176 }
  0x49   :  { %4499 = dma.done.wait [#allocation10], 4096  }
  0x4a   :  { %4500 = vsyncadd [#allocation10], 4294963200 }
  0x4b   :  { %4501 = dma.done.wait [#allocation13], 2048  }
  0x4c   :  { %4502 = vsyncadd [#allocation13], 4294965248  ;;  %v4517_v0 = vmov 0   ;;  %v4235_v1 = vld [vmem:[#allocation6 + $0x38] sm:$0xff]   ;;  %v4236_v2 = vld [vmem:[#allocation6 + $0x30] sm:$0xff]  }
  0x4d   :  { %896 = vmatprep.subr.bf16.mxu0 %v4517_v0  ;;  %v4237_v3 = vld [vmem:[#allocation6 + $0x28] sm:$0xff]   ;;  %v4238_v4 = vld [vmem:[#allocation6 + $0x20] sm:$0xff]   ;;  %v4239_v5 = vld [vmem:[#allocation6 + $0x18] sm:$0xff]  }
  0x4e   :  { %897 = vmatpush1.bf16.msra.mxu0 %v4235_v1  ;;  %v4240_v6 = vld [vmem:[#allocation6 + $0x10] sm:$0xff]   ;;  %v4609_v8 = vld [vmem:[#allocation6 + $0xb8] sm:$0xff]   ;;  %v4241_v9 = vld [vmem:[#allocation6 + $0x8] sm:$0xff]  }
  0x4f   :  { %898 = vmatprep.subr.bf16.mxu0 %v4517_v0  ;;  %v4253_v7 = vld [vmem:[#allocation3 + $0x4] ss:$12 sps:$4 sm:$0xff]   ;;  %4205 = vmatprep.subr.bf16.mxu1 %v4609_v8  ;;  %v4618_v11 = vld [vmem:[#allocation6 + $0xa8] sm:$0xff]   ;;  %v4243_v14 = vld [vmem:[#allocation6 + $0x78] sm:$0xff]  }
  0x50   :  { %928 = vmatprep.mubr.bf16.mxu0 %v4253_v7  ;;  %4213 = vmatpush3.bf16.msra.mxu1 %v4609_v8  ;;  %v4615_v10 = vld [vmem:[#allocation6 + $0xb0] sm:$0xff]   ;;  %v4242_v12 = vld [vmem:[#allocation6] sm:$0xff]   ;;  %v4628_v15 = vld [vmem:[#allocation6 + $0x98] sm:$0xff]  }
  0x51   :  { %4206 = vmatprep.subr.bf16.mxu1 %v4615_v10  ;;  %v4623_v13 = vld [vmem:[#allocation6 + $0xa0] sm:$0xff]   ;;  %v4244_v16 = vld [vmem:[#allocation6 + $0x70] sm:$0xff]   ;;  %v4245_v19 = vld [vmem:[#allocation6 + $0x68] sm:$0xff]  }
  0x52   :  { %899 = vmatpush1.bf16.msra.mxu0 %v4236_v2  ;;  %v4631_v17 = vld [vmem:[#allocation6 + $0x90] sm:$0xff]   ;;  %v4638_v20 = vld [vmem:[#allocation6 + $0x88] sm:$0xff]   ;;  %v4246_v21 = vld [vmem:[#allocation6 + $0x60] sm:$0xff]  }
  0x53   :  { %900 = vmatprep.subr.bf16.mxu0 %v4517_v0  ;;  %v4283_v18 = vld [vmem:[#allocation3 + $0xc8] ss:$12 sps:$4 sm:$0xff]   ;;  %v4643_v22 = vld [vmem:[#allocation6 + $0x80] sm:$0xff]   ;;  %v4247_v23 = vld [vmem:[#allocation6 + $0x58] sm:$0xff]  }
  0x54   :  { %4214 = vmatpush3.bf16.msra.mxu1 %v4615_v10  ;;  %3757 = vmatprep.mubr.bf16.mxu1 %v4283_v18  ;;  %v4248_v24 = vld [vmem:[#allocation6 + $0x50] sm:$0xff]   ;;  %v4284_v25 = vld [vmem:[#allocation3 + $0xe0] ss:$12 sps:$4 sm:$0xff]   ;;  %v4291_v26 = vld [vmem:[#allocation3 + $0xf8] ss:$12 sps:$4 sm:$0xff]  }
  0x55   :  { %4207 = vmatprep.subr.bf16.mxu1 %v4618_v11  ;;  %v4249_v27 = vld [vmem:[#allocation6 + $0x48] sm:$0xff]   ;;  %v4250_v28 = vld [vmem:[#allocation6 + $0x40] sm:$0xff]   ;;  %v4292_v29 = vld [vmem:[#allocation3 + $0x110] ss:$12 sps:$4 sm:$0xff]  }
  0x56   :  { %901 = vmatpush1.bf16.msra.mxu0 %v4237_v3  ;;  %v4299_v30 = vld [vmem:[#allocation3 + $0x128] ss:$12 sps:$4 sm:$0xff]   ;;  %v4251_v31 = vld [vmem:[#allocation3] ss:$12 sps:$4 sm:$0xff]   ;;  %v4307_v34 = vld [vmem:[#allocation3 + $0x158] ss:$12 sps:$4 sm:$0xff]  }
  0x57   :  { %902 = vmatprep.subr.bf16.mxu0 %v4517_v0  ;;  %v4255_v32 = vld [vmem:[#allocation3 + $0x1c] ss:$12 sps:$4 sm:$0xff]   ;;  %v4300_v33 = vld [vmem:[#allocation3 + $0x140] ss:$12 sps:$4 sm:$0xff]   ;;  %v4257_v35 = vld [vmem:[#allocation3 + $0x18] ss:$12 sps:$4 sm:$0xff]  }
  0x58   :  { %4215 = vmatpush3.bf16.msra.mxu1 %v4618_v11  ;;  %v4258_v36 = vld [vmem:[#allocation3 + $0x34] ss:$12 sps:$4 sm:$0xff]   ;;  %v4308_v37 = vld [vmem:[#allocation3 + $0x170] ss:$12 sps:$4 sm:$0xff]   ;;  %v4261_v40 = vld [vmem:[#allocation3 + $0x4c] ss:$12 sps:$4 sm:$0xff]  }
  0x59   :  { %4208 = vmatprep.subr.bf16.mxu1 %v4623_v13  ;;  %v4315_v38 = vld [vmem:[#allocation3 + $0x188] ss:$12 sps:$4 sm:$0xff]   ;;  %v4260_v39 = vld [vmem:[#allocation3 + $0x30] ss:$12 sps:$4 sm:$0xff]   ;;  %v4316_v41 = vld [vmem:[#allocation3 + $0x1a0] ss:$12 sps:$4 sm:$0xff]  }
  0x5a   :  { %903 = vmatpush1.bf16.msra.mxu0 %v4238_v4  ;;  %v4323_v42 = vld [vmem:[#allocation3 + $0x1b8] ss:$12 sps:$4 sm:$0xff]   ;;  %v4263_v43 = vld [vmem:[#allocation3 + $0x48] ss:$12 sps:$4 sm:$0xff]   ;;  %v4324_v45 = vld [vmem:[#allocation3 + $0x1d0] ss:$12 sps:$4 sm:$0xff]  }
  0x5b   :  { %904 = vmatprep.subr.bf16.mxu0 %v4517_v0  ;;  %v4265_v44 = vld [vmem:[#allocation3 + $0x64] ss:$12 sps:$4 sm:$0xff]   ;;  %v4331_v46 = vld [vmem:[#allocation3 + $0x1e8] ss:$12 sps:$4 sm:$0xff]   ;;  %v4267_v47 = vld [vmem:[#allocation3 + $0x60] ss:$12 sps:$4 sm:$0xff]  }
  0x5c   :  { %4216 = vmatpush3.bf16.msra.mxu1 %v4623_v13  ;;  %v4269_v48 = vld [vmem:[#allocation3 + $0x7c] ss:$12 sps:$4 sm:$0xff]   ;;  %v4332_v49 = vld [vmem:[#allocation3 + $0x200] ss:$12 sps:$4 sm:$0xff]   ;;  %v4271_v50 = vld [vmem:[#allocation3 + $0x78] ss:$12 sps:$4 sm:$0xff]  }
  0x5d   :  { %4209 = vmatprep.subr.bf16.mxu1 %v4628_v15  ;;  %v4274_v51 = vld [vmem:[#allocation3 + $0x94] ss:$12 sps:$4 sm:$0xff]   ;;  %v4339_v52 = vld [vmem:[#allocation3 + $0x218] ss:$12 sps:$4 sm:$0xff]   ;;  %v4340_v53 = vld [vmem:[#allocation3 + $0x230] ss:$12 sps:$4 sm:$0xff]  }
  0x5e   :  { %905 = vmatpush1.bf16.msra.mxu0 %v4239_v5  ;;  %v4276_v54 = vld [vmem:[#allocation3 + $0x90] ss:$12 sps:$4 sm:$0xff]   ;;  %v4279_v55 = vld [vmem:[#allocation3 + $0xac] ss:$12 sps:$4 sm:$0xff]   ;;  %v4281_v56 = vld [vmem:[#allocation3 + $0xa8] ss:$12 sps:$4 sm:$0xff]  }
  0x5f   :  { %906 = vmatprep.subr.bf16.mxu0 %v4517_v0  ;;  %v4285_v57 = vld [vmem:[#allocation3 + $0xc4] ss:$12 sps:$4 sm:$0xff]   ;;  %v4287_v58 = vld [vmem:[#allocation3 + $0xc0] ss:$12 sps:$4 sm:$0xff]   ;;  %v4288_v59 = vld [vmem:[#allocation3 + $0xdc] ss:$12 sps:$4 sm:$0xff]  }
  0x60   :  { %4217 = vmatpush3.bf16.msra.mxu1 %v4628_v15  ;;  %v4290_v60 = vld [vmem:[#allocation3 + $0xd8] ss:$12 sps:$4 sm:$0xff]   ;;  %v4293_v61 = vld [vmem:[#allocation3 + $0xf4] ss:$12 sps:$4 sm:$0xff]   ;;  %v4295_v62 = vld [vmem:[#allocation3 + $0xf0] ss:$12 sps:$4 sm:$0xff]  }
  0x61   :  { %4210 = vmatprep.subr.bf16.mxu1 %v4631_v17  ;;  %v4296_v63 = vld [vmem:[#allocation3 + $0x10c] ss:$12 sps:$4 sm:$0xff]   ;;  %v4301_v1 = vld [vmem:[#allocation3 + $0x124] ss:$12 sps:$4 sm:$0xff]   ;;  %v4304_v3 = vld [vmem:[#allocation3 + $0x13c] ss:$12 sps:$4 sm:$0xff]  }
  0x62   :  { %907 = vmatpush1.bf16.msra.mxu0 %v4240_v6  ;;  %v4303_v2 = vld [vmem:[#allocation3 + $0x120] ss:$12 sps:$4 sm:$0xff]   ;;  %v4306_v4 = vld [vmem:[#allocation3 + $0x138] ss:$12 sps:$4 sm:$0xff]   ;;  %v4311_v6 = vld [vmem:[#allocation3 + $0x150] ss:$12 sps:$4 sm:$0xff]  }
  0x63   :  { %908 = vmatprep.subr.bf16.mxu0 %v4517_v0  ;;  %v4309_v5 = vld [vmem:[#allocation3 + $0x154] ss:$12 sps:$4 sm:$0xff]   ;;  %v4312_v7 = vld [vmem:[#allocation3 + $0x16c] ss:$12 sps:$4 sm:$0xff]  }
  0x64   :  { %4218 = vmatpush3.bf16.msra.mxu1 %v4631_v17  ;;  %v4335_v18 = vld [vmem:[#allocation3 + $0x1e0] ss:$12 sps:$4 sm:$0xff]  }
  0x65   :  { %4211 = vmatprep.subr.bf16.mxu1 %v4638_v20 }
  0x66   :  { %909 = vmatpush1.bf16.msra.mxu0 %v4241_v9  ;;  %v4317_v9 = vld [vmem:[#allocation3 + $0x184] ss:$12 sps:$4 sm:$0xff]  }
  0x67   :  { %910 = vmatprep.subr.bf16.mxu0 %v4517_v0 }
  0x68   :  { %4219 = vmatpush3.bf16.msra.mxu1 %v4638_v20 }
  0x69   :  { %4212 = vmatprep.subr.bf16.mxu1 %v4643_v22 }
  0x6a   :  { %911 = vmatpush1.bf16.msra.mxu0 %v4242_v12  ;;  %v4322_v12 = vld [vmem:[#allocation3 + $0x198] ss:$12 sps:$4 sm:$0xff]  }
  0x6b   :  { %912 = vmatprep.subr.bf16.mxu0 %v4517_v0 }
  0x6c   :  { %4220 = vmatpush3.bf16.msra.mxu1 %v4643_v22 }
  0x6e   :  { %913 = vmatpush2.bf16.msra.mxu0 %v4243_v14  ;;  %v4327_v14 = vld [vmem:[#allocation3 + $0x1b0] ss:$12 sps:$4 sm:$0xff]  }
  0x6f   :  { %914 = vmatprep.subr.bf16.mxu0 %v4517_v0  ;;  %3758 = vmatmul.mubr.bf16.vlgmr.msra.gmra.mxu1 %v4284_v25  ;;  %v4347_v25 = vld [vmem:[#allocation3 + $0x8] ss:$12 sps:$4 sm:$0xff]  }
  0x70   :  { %3761 = vmatprep.mubr.bf16.mxu1 %v4291_v26  ;;  %v4348_v26 = vld [vmem:[#allocation3 + $0x20] ss:$12 sps:$4 sm:$0xff]  }
  0x72   :  { %915 = vmatpush2.bf16.msra.mxu0 %v4244_v16  ;;  %v4330_v16 = vld [vmem:[#allocation3 + $0x1c8] ss:$12 sps:$4 sm:$0xff]  }
  0x73   :  { %916 = vmatprep.subr.bf16.mxu0 %v4517_v0 }
  0x76   :  { %917 = vmatpush2.bf16.msra.mxu0 %v4245_v19  ;;  %v4336_v19 = vld [vmem:[#allocation3 + $0x1fc] ss:$12 sps:$4 sm:$0xff]  }
  0x77   :  { %918 = vmatprep.subr.bf16.mxu0 %v4517_v0  ;;  %3762 = vmatmul.mubr.bf16.gmra.mxu1 %v4292_v29 }
  0x78   :  { %3765 = vmatprep.mubr.bf16.mxu1 %v4299_v30 }
  0x7a   :  { %919 = vmatpush2.bf16.msra.mxu0 %v4246_v21  ;;  %v4341_v21 = vld [vmem:[#allocation3 + $0x214] ss:$12 sps:$4 sm:$0xff]  }
  0x7b   :  { %920 = vmatprep.subr.bf16.mxu0 %v4517_v0 }
  0x7e   :  { %921 = vmatpush2.bf16.msra.mxu0 %v4247_v23  ;;  %v4344_v23 = vld [vmem:[#allocation3 + $0x22c] ss:$12 sps:$4 sm:$0xff]  }
  0x7f   :  { %922 = vmatprep.subr.bf16.mxu0 %v4517_v0  ;;  %3766 = vmatmul.mubr.bf16.gmra.mxu1 %v4300_v33 }
  0x80   :  { %3769 = vmatprep.mubr.bf16.mxu1 %v4307_v34 }
  0x82   :  { %923 = vmatpush2.bf16.msra.mxu0 %v4248_v24  ;;  %v4346_v24 = vld [vmem:[#allocation3 + $0x228] ss:$12 sps:$4 sm:$0xff]  }
  0x83   :  { %924 = vmatprep.subr.bf16.mxu0 %v4517_v0 }
  0x86   :  { %925 = vmatpush2.bf16.msra.mxu0 %v4249_v27  ;;  %v4349_v27 = vld [vmem:[#allocation3 + $0x38] ss:$12 sps:$4 sm:$0xff]  }
  0x87   :  { %926 = vmatprep.subr.bf16.mxu0 %v4517_v0  ;;  %3770 = vmatmul.mubr.bf16.gmra.mxu1 %v4308_v37  ;;  %v4298_v0 = vld [vmem:[#allocation3 + $0x108] ss:$12 sps:$4 sm:$0xff]  }
  0x88   :  { %3773 = vmatprep.mubr.bf16.mxu1 %v4315_v38  ;;  %v4352_v38 = vld [vmem:[#allocation3 + $0x80] ss:$12 sps:$4 sm:$0xff]  }
  0x8a   :  { %927 = vmatpush2.bf16.msra.mxu0 %v4250_v28 }
  0x8b   :  { %3725 = vmatprep.subr.bf16.mxu0 %v4609_v8 }
  0x8d   :  { %929 = vmatmul.mubr.bf16.vlgmr.msra.gmra.mxu0 %v4251_v31  ;;  %v4350_v31 = vld [vmem:[#allocation3 + $0x50] ss:$12 sps:$4 sm:$0xff]  }
  0x8e   :  { %3726 = vmatpush3.bf16.msra.mxu0 %v4609_v8  ;;  %936 = vmatprep.mubr.bf16.mxu0 %v4255_v32  ;;  %v4314_v8 = vld [vmem:[#allocation3 + $0x168] ss:$12 sps:$4 sm:$0xff]  }
  0x8f   :  { %3727 = vmatprep.subr.bf16.mxu0 %v4615_v10  ;;  %3774 = vmatmul.mubr.bf16.gmra.mxu1 %v4316_v41  ;;  %v4351_v32 = vld [vmem:[#allocation3 + $0x68] ss:$12 sps:$4 sm:$0xff]  }
  0x90   :  { %3777 = vmatprep.mubr.bf16.mxu1 %v4323_v42 }
  0x92   :  { %3728 = vmatpush3.bf16.msra.mxu0 %v4615_v10  ;;  %v4319_v10 = vld [vmem:[#allocation3 + $0x180] ss:$12 sps:$4 sm:$0xff]  }
  0x93   :  { %3729 = vmatprep.subr.bf16.mxu0 %v4618_v11 }
  0x95   :  { %937 = vmatmul.mubr.bf16.gmra.mxu0 %v4257_v35  ;;  %v1625_v35 = vld [vmem:[#allocation9 + $0x78] sm:$0xff] }
  0x96   :  { %944 = vmatprep.mubr.bf16.mxu0 %v4258_v36  ;;  %3730 = vmatpush3.bf16.msra.mxu0 %v4618_v11  ;;  %v4320_v11 = vld [vmem:[#allocation3 + $0x19c] ss:$12 sps:$4 sm:$0xff]  }
  0x97   :  { %3731 = vmatprep.subr.bf16.mxu0 %v4623_v13  ;;  %3778 = vmatmul.mubr.bf16.gmra.mxu1 %v4324_v45 }
  0x98   :  { %3781 = vmatprep.mubr.bf16.mxu1 %v4331_v46  ;;  %3789 = vmatprep.subr.mxu1 %v1625_v35  ;;  %v4354_v46 = vld [vmem:[#allocation3 + $0xb0] ss:$12 sps:$4 sm:$0xff]  }
  0x99   :  { %3790 = vmatpush3.msra.mxu1 %v1625_v35 }
  0x9a   :  { %3732 = vmatpush3.bf16.msra.mxu0 %v4623_v13  ;;  %v4325_v13 = vld [vmem:[#allocation3 + $0x1b4] ss:$12 sps:$4 sm:$0xff]  }
  0x9b   :  { %3733 = vmatprep.subr.bf16.mxu0 %v4628_v15 }
  0x9d   :  { %945 = vmatmul.mubr.bf16.gmra.mxu0 %v4260_v39  ;;  %v4353_v39 = vld [vmem:[#allocation3 + $0x98] ss:$12 sps:$4 sm:$0xff]  }
  0x9e   :  { %952 = vmatprep.mubr.bf16.mxu0 %v4261_v40  ;;  %3734 = vmatpush3.bf16.msra.mxu0 %v4628_v15  ;;  %v4328_v15 = vld [vmem:[#allocation3 + $0x1cc] ss:$12 sps:$4 sm:$0xff]   ;;  %v1624_v40 = vld [vmem:[#allocation9 + $0x70] sm:$0xff] }
  0x9f   :  { %3735 = vmatprep.subr.bf16.mxu0 %v4631_v17  ;;  %3782 = vmatmul.mubr.bf16.gmra.mxu1 %v4332_v49 }
  0xa0   :  { %3785 = vmatprep.mubr.bf16.mxu1 %v4339_v52  ;;  %3791 = vmatprep.subr.mxu1 %v1624_v40 }
  0xa1   :  { %3792 = vmatpush3.msra.mxu1 %v1624_v40 }
  0xa2   :  { %3736 = vmatpush3.bf16.msra.mxu0 %v4631_v17  ;;  %v4333_v17 = vld [vmem:[#allocation3 + $0x1e4] ss:$12 sps:$4 sm:$0xff]  }
  0xa3   :  { %3737 = vmatprep.subr.bf16.mxu0 %v4638_v20 }
  0xa5   :  { %953 = vmatmul.mubr.bf16.gmra.mxu0 %v4263_v43  ;;  %v1623_v43 = vld [vmem:[#allocation9 + $0x68] sm:$0xff] }
  0xa6   :  { %960 = vmatprep.mubr.bf16.mxu0 %v4265_v44  ;;  %3738 = vmatpush3.bf16.msra.mxu0 %v4638_v20  ;;  %v4338_v20 = vld [vmem:[#allocation3 + $0x1f8] ss:$12 sps:$4 sm:$0xff]  }
  0xa7   :  { %3739 = vmatprep.subr.bf16.mxu0 %v4643_v22  ;;  %3786 = vmatmul.mubr.bf16.gmra.mxu1 %v4340_v53  ;;  %v1620_v53 = vld [vmem:[#allocation9 + $0x50] sm:$0xff] }
  0xa8   :  { %3793 = vmatprep.subr.mxu1 %v1623_v43 }
  0xa9   :  { %3794 = vmatpush3.msra.mxu1 %v1623_v43 }
  0xaa   :  { %3740 = vmatpush3.bf16.msra.mxu0 %v4643_v22  ;;  %v4343_v22 = vld [vmem:[#allocation3 + $0x210] ss:$12 sps:$4 sm:$0xff]  }
  0xad   :  { %961 = vmatmul.mubr.bf16.gmra.mxu0 %v4267_v47  ;;  %v1622_v47 = vld [vmem:[#allocation9 + $0x60] sm:$0xff] }
  0xae   :  { %968 = vmatprep.mubr.bf16.mxu0 %v4269_v48  ;;  %3795 = vmatprep.subr.mxu1 %v1622_v47 }
  0xaf   :  { %3796 = vmatpush3.msra.mxu1 %v1622_v47 }
  0xb5   :  { %969 = vmatmul.mubr.bf16.gmra.mxu0 %v4271_v50  ;;  %v1621_v50 = vld [vmem:[#allocation9 + $0x58] sm:$0xff] }
  0xb6   :  { %976 = vmatprep.mubr.bf16.mxu0 %v4274_v51  ;;  %3797 = vmatprep.subr.mxu1 %v1621_v50 }
  0xb7   :  { %3798 = vmatpush3.msra.mxu1 %v1621_v50 }
  0xb8   :  { %3799 = vmatprep.subr.mxu1 %v1620_v53 }
  0xb9   :  { %3800 = vmatpush3.msra.mxu1 %v1620_v53 }
  0xbd   :  { %977 = vmatmul.mubr.bf16.gmra.mxu0 %v4276_v54 }
  0xbe   :  { %984 = vmatprep.mubr.bf16.mxu0 %v4279_v55 }
  0xc5   :  { %985 = vmatmul.mubr.bf16.gmra.mxu0 %v4281_v56  ;;  %v1619_v56 = vld [vmem:[#allocation9 + $0x48] sm:$0xff] }
  0xc6   :  { %992 = vmatprep.mubr.bf16.mxu0 %v4285_v57  ;;  %3801 = vmatprep.subr.mxu1 %v1619_v56 }
  0xc7   :  { %3802 = vmatpush3.msra.mxu1 %v1619_v56 }
  0xcd   :  { %993 = vmatmul.mubr.bf16.gmra.mxu0 %v4287_v58 }
  0xce   :  { %1000 = vmatprep.mubr.bf16.mxu0 %v4288_v59  ;;  %v1618_v59 = vld [vmem:[#allocation9 + $0x40] sm:$0xff] }
  0xcf   :  { %3803 = vmatprep.subr.mxu1 %v1618_v59 }
  0xd0   :  { %3804 = vmatpush3.msra.mxu1 %v1618_v59 }
  0xd5   :  { %1001 = vmatmul.mubr.bf16.gmra.mxu0 %v4290_v60 }
  0xd6   :  { %1008 = vmatprep.mubr.bf16.mxu0 %v4293_v61 }
  0xdd   :  { %1009 = vmatmul.mubr.bf16.gmra.mxu0 %v4295_v62  ;;  %v1617_v62 = vld [vmem:[#allocation9 + $0x38] sm:$0xff] }
  0xde   :  { %1016 = vmatprep.mubr.bf16.mxu0 %v4296_v63  ;;  %3805 = vmatprep.subr.mxu1 %v1617_v62 }
  0xdf   :  { %3806 = vmatpush3.msra.mxu1 %v1617_v62 }
  0xe5   :  { %1017 = vmatmul.mubr.bf16.gmra.mxu0 %v4298_v0 }
  0xe6   :  { %1024 = vmatprep.mubr.bf16.mxu0 %v4301_v1  ;;  %v1616_v1 = vld [vmem:[#allocation9 + $0x30] sm:$0xff] }
  0xe7   :  { %3807 = vmatprep.subr.mxu1 %v1616_v1 }
  0xe8   :  { %3808 = vmatpush3.msra.mxu1 %v1616_v1 }
  0xed   :  { %1025 = vmatmul.mubr.bf16.gmra.mxu0 %v4303_v2 }
  0xee   :  { %1032 = vmatprep.mubr.bf16.mxu0 %v4304_v3 }
  0xf5   :  { %1033 = vmatmul.mubr.bf16.gmra.mxu0 %v4306_v4  ;;  %v1615_v4 = vld [vmem:[#allocation9 + $0x28] sm:$0xff] }
  0xf6   :  { %1040 = vmatprep.mubr.bf16.mxu0 %v4309_v5  ;;  %3809 = vmatprep.subr.mxu1 %v1615_v4 }
  0xf7   :  { %3810 = vmatpush3.msra.mxu1 %v1615_v4 }
  0xfd   :  { %1041 = vmatmul.mubr.bf16.gmra.mxu0 %v4311_v6 }
  0xfe   :  { %1048 = vmatprep.mubr.bf16.mxu0 %v4312_v7  ;;  %v1614_v7 = vld [vmem:[#allocation9 + $0x20] sm:$0xff] }
  0xff   :  { %3811 = vmatprep.subr.mxu1 %v1614_v7 }
 0x100   :  { %3812 = vmatpush3.msra.mxu1 %v1614_v7 }
 0x105   :  { %1049 = vmatmul.mubr.bf16.gmra.mxu0 %v4314_v8 }
 0x106   :  { %1056 = vmatprep.mubr.bf16.mxu0 %v4317_v9 }
 0x10d   :  { %1057 = vmatmul.mubr.bf16.gmra.mxu0 %v4319_v10  ;;  %v1613_v10 = vld [vmem:[#allocation9 + $0x18] sm:$0xff] }
 0x10e   :  { %1064 = vmatprep.mubr.bf16.mxu0 %v4320_v11  ;;  %3813 = vmatprep.subr.mxu1 %v1613_v10 }
 0x10f   :  { %3814 = vmatpush3.msra.mxu1 %v1613_v10 }
 0x115   :  { %1065 = vmatmul.mubr.bf16.gmra.mxu0 %v4322_v12 }
 0x116   :  { %1072 = vmatprep.mubr.bf16.mxu0 %v4325_v13  ;;  %v1612_v13 = vld [vmem:[#allocation9 + $0x10] sm:$0xff] }
 0x117   :  { %3815 = vmatprep.subr.mxu1 %v1612_v13 }
 0x118   :  { %3816 = vmatpush3.msra.mxu1 %v1612_v13 }
 0x11d   :  { %1073 = vmatmul.mubr.bf16.gmra.mxu0 %v4327_v14 }
 0x11e   :  { %1080 = vmatprep.mubr.bf16.mxu0 %v4328_v15 }
 0x125   :  { %1081 = vmatmul.mubr.bf16.gmra.mxu0 %v4330_v16  ;;  %v1611_v16 = vld [vmem:[#allocation9 + $0x8] sm:$0xff] }
 0x126   :  { %1088 = vmatprep.mubr.bf16.mxu0 %v4333_v17  ;;  %3817 = vmatprep.subr.mxu1 %v1611_v16 }
 0x127   :  { %3818 = vmatpush3.msra.mxu1 %v1611_v16 }
 0x12d   :  { %1089 = vmatmul.mubr.bf16.gmra.mxu0 %v4335_v18 }
 0x12e   :  { %1096 = vmatprep.mubr.bf16.mxu0 %v4336_v19  ;;  %v1610_v19 = vld [vmem:[#allocation9] sm:$0xff] }
 0x12f   :  { %3819 = vmatprep.subr.mxu1 %v1610_v19 }
 0x130   :  { %3820 = vmatpush3.msra.mxu1 %v1610_v19 }
 0x135   :  { %1097 = vmatmul.mubr.bf16.gmra.mxu0 %v4338_v20 }
 0x136   :  { %1104 = vmatprep.mubr.bf16.mxu0 %v4341_v21 }
 0x13d   :  { %1105 = vmatmul.mubr.bf16.gmra.mxu0 %v4343_v22  ;;  %v4706_v22 = vld [vmem:[#allocation8 + $0x78] sm:$0xff] }
 0x13e   :  { %1112 = vmatprep.mubr.bf16.mxu0 %v4344_v23  ;;  %3893 = vmatprep.subr.mxu1 %v4706_v22 }
 0x145   :  { %1113 = vmatmul.mubr.bf16.gmra.mxu0 %v4346_v24 }
 0x146   :  { %3741 = vmatprep.mubr.bf16.mxu0 %v4347_v25 }
 0x14d   :  { %v4668_v28 = vpop.f32.mrf.mxu0  ;;  %3742 = vmatmul.mubr.bf16.vlgmr.msra.gmra.mxu0 %v4348_v26 }
 0x14e   :  { %3745 = vmatprep.mubr.bf16.mxu0 %v4349_v27 }
 0x14f   :  { %v932_v29 = vpop.f32.mrf.mxu0 }
 0x151   :  { %v4670_v30 = vpop.f32.mrf.mxu0 }
 0x153   :  { %v935_v33 = vpop.f32.mrf.mxu0 }
 0x155   :  { %v4672_v34 = vpop.f32.mrf.mxu0  ;;  %3746 = vmatmul.mubr.bf16.gmra.mxu0 %v4350_v31 }
 0x156   :  { %3749 = vmatprep.mubr.bf16.mxu0 %v4351_v32 }
 0x157   :  { %v940_v36 = vpop.f32.mrf.mxu0 }
 0x159   :  { %v4674_v37 = vpop.f32.mrf.mxu0 }
 0x15b   :  { %v943_v41 = vpop.f32.mrf.mxu0 }
 0x15d   :  { %v4676_v42 = vpop.f32.mrf.mxu0  ;;  %3750 = vmatmul.mubr.bf16.gmra.mxu0 %v4352_v38 }
 0x15e   :  { %3753 = vmatprep.mubr.bf16.mxu0 %v4353_v39 }
 0x15f   :  { %v948_v44 = vpop.f32.mrf.mxu0 }
 0x161   :  { %v4678_v45 = vpop.f32.mrf.mxu0 }
 0x163   :  { %v951_v48 = vpop.f32.mrf.mxu0 }
 0x165   :  { %v4680_v49 = vpop.f32.mrf.mxu0  ;;  %3754 = vmatmul.mubr.bf16.gmra.mxu0 %v4354_v46 }
 0x167   :  { %v956_v51 = vpop.f32.mrf.mxu0 }
 0x169   :  { %v4682_v52 = vpop.f32.mrf.mxu0 }
 0x16b   :  { %v959_v54 = vpop.f32.mrf.mxu0 }
 0x16d   :  { %v4684_v55 = vpop.f32.mrf.mxu0 }
 0x16f   :  { %v964_v57 = vpop.f32.mrf.mxu0 }
 0x171   :  { %v4686_v58 = vpop.f32.mrf.mxu0 }
 0x173   :  { %v967_v60 = vpop.f32.mrf.mxu0 }
 0x175   :  { %v4688_v61 = vpop.f32.mrf.mxu0 }
 0x177   :  { %v972_v63 = vpop.f32.mrf.mxu0 }
 0x179   :  { %v4690_v0 = vpop.f32.mrf.mxu0 }
 0x17b   :  { %v975_v2 = vpop.f32.mrf.mxu0 }
 0x17d   :  { %v4692_v3 = vpop.f32.mrf.mxu0 }
 0x17f   :  { %v980_v5 = vpop.f32.mrf.mxu0 }
 0x181   :  { %v4694_v6 = vpop.f32.mrf.mxu0 }
 0x183   :  { %v983_v8 = vpop.f32.mrf.mxu0 }
 0x185   :  { %v4696_v9 = vpop.f32.mrf.mxu0 }
 0x187   :  { %v988_v11 = vpop.f32.mrf.mxu0 }
 0x189   :  { %v4698_v12 = vpop.f32.mrf.mxu0 }
 0x18b   :  { %v991_v14 = vpop.f32.mrf.mxu0 }
 0x18d   :  { %v4700_v15 = vpop.f32.mrf.mxu0 }
 0x18f   :  { %v996_v17 = vpop.f32.mrf.mxu0 }
 0x191   :  { %v4702_v18 = vpop.f32.mrf.mxu0 }
 0x193   :  { %v999_v20 = vpop.f32.mrf.mxu0 }
 0x195   :  { %v4704_v21 = vpop.f32.mrf.mxu0 }
 0x197   :  { %v1004_v23 = vpop.f32.mrf.mxu0 }
 0x199   :  { %v4709_v24 = vpop.f32.mrf.mxu0 }
 0x19b   :  { %v1007_v25 = vpop.f32.mrf.mxu0 }
 0x19d   :  { %v4711_v26 = vpop.f32.mrf.mxu0 }
 0x19f   :  { %v1012_v27 = vpop.f32.mrf.mxu0 }
 0x1a1   :  { %v4713_v29 = vpop.f32.mrf.mxu0 }
 0x1a3   :  { %v1015_v31 = vpop.f32.mrf.mxu0 }
 0x1a5   :  { %v4715_v32 = vpop.f32.mrf.mxu0 }
 0x1a7   :  { %v1020_v33 = vpop.f32.mrf.mxu0 }
 0x1a9   :  { %v4717_v35 = vpop.f32.mrf.mxu0 }
 0x1ab   :  { %v1023_v36 = vpop.f32.mrf.mxu0 }
 0x1ad   :  { %v4719_v38 = vpop.f32.mrf.mxu0 }
 0x1af   :  { %v1028_v39 = vpop.f32.mrf.mxu0 }
 0x1b0   :  { %v4759_v39 = vpop.f32.mrf.mxu1 }
 0x1b1   :  { %v4721_v40 = vpop.f32.mrf.mxu0 }
 0x1b3   :  { %v1031_v41 = vpop.f32.mrf.mxu0 }
 0x1b5   :  { %v4723_v43 = vpop.f32.mrf.mxu0 }
 0x1b7   :  { %v1036_v44 = vpop.f32.mrf.mxu0 }
 0x1b9   :  { %v4725_v46 = vpop.f32.mrf.mxu0 }
 0x1bb   :  { %v1039_v47 = vpop.f32.mrf.mxu0 }
 0x1bc   :  { %v4763_v47 = vpop.f32.mrf.mxu1 }
 0x1bd   :  { %v4727_v48 = vpop.f32.mrf.mxu0 }
 0x1bf   :  { %v1044_v50 = vpop.f32.mrf.mxu0 }
 0x1c1   :  { %v4729_v51 = vpop.f32.mrf.mxu0 }
 0x1c3   :  { %v1047_v53 = vpop.f32.mrf.mxu0 }
 0x1c5   :  { %v4731_v54 = vpop.f32.mrf.mxu0 }
 0x1c7   :  { %v1052_v56 = vpop.f32.mrf.mxu0 }
 0x1c8   :  { %v4767_v56 = vpop.f32.mrf.mxu1 }
 0x1c9   :  { %v4733_v57 = vpop.f32.mrf.mxu0 }
 0x1cb   :  { %v1055_v59 = vpop.f32.mrf.mxu0 }
 0x1cd   :  { %v4735_v60 = vpop.f32.mrf.mxu0 }
 0x1cf   :  { %v1060_v62 = vpop.f32.mrf.mxu0 }
 0x1d1   :  { %v4737_v63 = vpop.f32.mrf.mxu0 }
 0x1d3   :  { %v1063_v1 = vpop.f32.mrf.mxu0 }
 0x1d4   :  { %v4771_v1 = vpop.f32.mrf.mxu1 }
 0x1d5   :  { %v4739_v2 = vpop.f32.mrf.mxu0 }
 0x1d7   :  { %v1068_v4 = vpop.f32.mrf.mxu0 }
 0x1d9   :  { %v4741_v5 = vpop.f32.mrf.mxu0 }
 0x1db   :  { %v1071_v7 = vpop.f32.mrf.mxu0 }
 0x1dc   :  { %v4773_v7 = vpop.f32.mrf.mxu1 }
 0x1dd   :  { %v4743_v8 = vpop.f32.mrf.mxu0 }
 0x1df   :  { %v1076_v10 = vpop.f32.mrf.mxu0 }
 0x1e1   :  { %v4745_v11 = vpop.f32.mrf.mxu0 }
 0x1e3   :  { %v1079_v13 = vpop.f32.mrf.mxu0 }
 0x1e5   :  { %v4747_v14 = vpop.f32.mrf.mxu0 }
 0x1e7   :  { %v1084_v16 = vpop.f32.mrf.mxu0 }
 0x1e8   :  { %v4777_v16 = vpop.f32.mrf.mxu1 }
 0x1e9   :  { %v4749_v17 = vpop.f32.mrf.mxu0 }
 0x1eb   :  { %v1087_v19 = vpop.f32.mrf.mxu0 }
 0x1ed   :  { %v4751_v20 = vpop.f32.mrf.mxu0 }
 0x1ef   :  { %v1092_v23 = vpop.f32.mrf.mxu0 }
 0x1f1   :  { %v4753_v25 = vpop.f32.mrf.mxu0 }
 0x1f3   :  { %v1095_v27 = vpop.f32.mrf.mxu0 }
 0x1f5   :  { %v4755_v31 = vpop.f32.mrf.mxu0 }
 0x1f7   :  { %v1100_v33 = vpop.f32.mrf.mxu0 }
 0x1f8   :  { %v4780_v33 = vpop.f32.mrf.mxu1 }
 0x1f9   :  { %v4757_v36 = vpop.f32.mrf.mxu0 }
 0x1fb   :  { %v1103_v41 = vpop.f32.mrf.mxu0 }
 0x1fd   :  { %v4761_v44 = vpop.f32.mrf.mxu0 }
 0x1fe   :  { %5228 = vst [vmem:[#allocation20_spill] sm:$0xff] %v4761_v44 }
 0x1ff   :  { %v1108_v50 = vpop.f32.mrf.mxu0 }
 0x201   :  { %v4765_v53 = vpop.f32.mrf.mxu0 }
 0x202   :  { %5229 = vst [vmem:[#allocation21_spill] sm:$0xff] %v4765_v53 }
 0x203   :  { %v1111_v59 = vpop.f32.mrf.mxu0 }
 0x205   :  { %v4769_v62 = vpop.f32.mrf.mxu0 }
 0x206   :  { %5230 = vst [vmem:[#allocation22_spill] sm:$0xff] %v4769_v62  ;;  %v4783_v62 = vpop.f32.mrf.mxu1 }
 0x207   :  { %v1116_v4 = vpop.f32.mrf.mxu0 }
 0x209   :  { %v4775_v10 = vpop.f32.mrf.mxu0 }
 0x20a   :  { %5231 = vst [vmem:[#allocation23_spill] sm:$0xff] %v4775_v10  ;;  %v1608_v10 = vld [vmem:[#allocation8 + $0x70] sm:$0xff] }
 0x20b   :  { %v1119_v13 = vpop.f32.mrf.mxu0 }
 0x20c   :  { %v4786_v13 = vpop.f32.mrf.mxu1 }
 0x20d   :  { %v3743_v19 = vpop.f32.mrf.mxu0 }
 0x20e   :  { %v1164_v4 = vadd.f32 %v3743_v19, %v4672_v34  ;;  %v4791_v34 = vpop.f32.mrf.mxu1 }
 0x20f   :  { %v1155_v23 = vpop.f32.mrf.mxu0 }
 0x210   :  { %v1156_v27 = vadd.f32 %v1155_v23, %v4668_v28  ;;  %v1607_v28 = vld [vmem:[#allocation8 + $0x68] sm:$0xff] }
 0x211   :  { %v3744_v41 = vpop.f32.mrf.mxu0 }
 0x212   :  { %3821 = vmatprep.mubr.f32.mxu1 %v1156_v27  ;;  %v1167_v23 = vadd.f32 %v3744_v41, %v4674_v37  ;;  %v1603_v41 = vld [vmem:[#allocation8 + $0x48] sm:$0xff] }
 0x213   :  { %v1158_v50 = vpop.f32.mrf.mxu0 }
 0x214   :  { %v1159_v59 = vadd.f32 %v1158_v50, %v4670_v30  ;;  %v1606_v50 = vld [vmem:[#allocation8 + $0x60] sm:$0xff] }
 0x215   :  { %v3747_v53 = vpop.f32.mrf.mxu0 }
 0x216   :  { %3822 = vmatmul.mubr.f32.vlgmr.msra.gmra.mxu1 %v1159_v59  ;;  %v1605_v59 = vld [vmem:[#allocation8 + $0x58] sm:$0xff] }
 0x217   :  { %v1171_v44 = vpop.f32.mrf.mxu0  ;;  %3824 = vmatprep.mubr.f32.mxu1 %v1164_v4  ;;  %3894 = vmatpush3.msra.mxu1 %v4706_v22  ;;  %v1180_v22 = vadd.f32 %v3747_v53, %v4680_v49 }
 0x218   :  { %v1172_v27 = vadd.f32 %v1171_v44, %v4676_v42  ;;  %3895 = vmatprep.subr.mxu1 %v1608_v10  ;;  %v1604_v42 = vld [vmem:[#allocation8 + $0x50] sm:$0xff]  ;;  %v4795_v44 = vpop.f32.mrf.mxu1 }
 0x219   :  { %v3748_v30 = vpop.f32.mrf.mxu0  ;;  %3896 = vmatpush3.msra.mxu1 %v1608_v10 }
 0x21a   :  { %3825 = vmatmul.mubr.f32.gmra.mxu1 %v1167_v23  ;;  %3897 = vmatprep.subr.mxu1 %v1607_v28  ;;  %v1183_v23 = vadd.f32 %v3748_v30, %v4682_v52  ;;  %v4799_v49 = vpop.f32.mrf.mxu1  ;;  %v1600_v30 = vld [vmem:[#allocation8 + $0x30] sm:$0xff] }
 0x21b   :  { %v1174_v19 = vpop.f32.mrf.mxu0  ;;  %3827 = vmatprep.mubr.f32.mxu1 %v1172_v27  ;;  %3898 = vmatpush3.msra.mxu1 %v1607_v28  ;;  %v1602_v27 = vld [vmem:[#allocation8 + $0x40] sm:$0xff] }
 0x21c   :  { %v1175_v4 = vadd.f32 %v1174_v19, %v4678_v45  ;;  %3899 = vmatprep.subr.mxu1 %v1606_v50 }
 0x21d   :  { %v3751_v37 = vpop.f32.mrf.mxu0  ;;  %3900 = vmatpush3.msra.mxu1 %v1606_v50  ;;  %v1601_v50 = vld [vmem:[#allocation8 + $0x38] sm:$0xff] }
 0x21e   :  { %3828 = vmatmul.mubr.f32.gmra.mxu1 %v1175_v4  ;;  %3901 = vmatprep.subr.mxu1 %v1605_v59  ;;  %v1196_v52 = vadd.f32 %v3751_v37, %v4688_v61  ;;  %v1597_v37 = vld [vmem:[#allocation8 + $0x18] sm:$0xff] }
 0x21f   :  { %v1187_v10 = vpop.f32.mrf.mxu0  ;;  %3830 = vmatprep.mubr.f32.mxu1 %v1180_v22  ;;  %3902 = vmatpush3.msra.mxu1 %v1605_v59  ;;  %v4802_v59 = vpop.f32.mrf.mxu1  ;;  %v1599_v22 = vld [vmem:[#allocation8 + $0x28] sm:$0xff] }
 0x220   :  { %v1188_v28 = vadd.f32 %v1187_v10, %v4684_v55  ;;  %3903 = vmatprep.subr.mxu1 %v1604_v42 }
 0x221   :  { %v3752_v45 = vpop.f32.mrf.mxu0  ;;  %3904 = vmatpush3.msra.mxu1 %v1604_v42 }
 0x222   :  { %3831 = vmatmul.mubr.f32.gmra.mxu1 %v1183_v23  ;;  %3905 = vmatprep.subr.mxu1 %v1603_v41  ;;  %v1199_v42 = vadd.f32 %v3752_v45, %v4690_v0  ;;  %v1598_v23 = vld [vmem:[#allocation8 + $0x20] sm:$0xff]  ;;  %v1596_v0 = vld [vmem:[#allocation8 + $0x10] sm:$0xff] }
 0x223   :  { %v1190_v53 = vpop.f32.mrf.mxu0  ;;  %3833 = vmatprep.mubr.f32.mxu1 %v1188_v28  ;;  %3906 = vmatpush3.msra.mxu1 %v1603_v41 }
 0x224   :  { %v1191_v19 = vadd.f32 %v1190_v53, %v4686_v58  ;;  %3907 = vmatprep.subr.mxu1 %v1602_v27  ;;  %v1267_v58 = vpop.f32.mrf.mxu1 }
 0x225   :  { %v3755_v55 = vpop.f32.mrf.mxu0  ;;  %3908 = vmatpush3.msra.mxu1 %v1602_v27 }
 0x226   :  { %3834 = vmatmul.mubr.f32.gmra.mxu1 %v1191_v19  ;;  %3909 = vmatprep.subr.mxu1 %v1601_v50  ;;  %v3772_v27 = vpop.f32.mrf.mxu1  ;;  %v1212_v53 = vadd.f32 %v3755_v55, %v4696_v9  ;;  %v1223_v9 = vadd.f32 %v4771_v1, %v4702_v18  ;;  %v1228_v55 = vadd.f32 %v4759_v39, %v4704_v21 }
 0x227   :  { %v1203_v4 = vpop.f32.mrf.mxu0  ;;  %3836 = vmatprep.mubr.f32.mxu1 %v1196_v52  ;;  %3910 = vmatpush3.msra.mxu1 %v1601_v50  ;;  %v1220_v50 = vadd.f32 %v4763_v47, %v4700_v15  ;;  %v1231_v15 = vadd.f32 %v4767_v56, %v4709_v24  ;;  %v1236_v47 = vadd.f32 %v4777_v16, %v4711_v26 }
 0x228   :  { %v1204_v10 = vadd.f32 %v1203_v4, %v4692_v3  ;;  %3911 = vmatprep.subr.mxu1 %v1600_v30  ;;  %v1595_v3 = vld [vmem:[#allocation8 + $0x8] sm:$0xff]  ;;  %v1270_v19 = vpop.f32.mrf.mxu1  ;;  %v1239_v18 = vadd.f32 %v4783_v62, %v4713_v29  ;;  %v1244_v1 = vadd.f32 %v4773_v7, %v4715_v32  ;;  %v1247_v39 = vadd.f32 %v4780_v33, %v4717_v35 }
 0x229   :  { %v3756_v41 = vpop.f32.mrf.mxu0  ;;  %3912 = vmatpush3.msra.mxu1 %v1600_v30  ;;  %v1252_v24 = vadd.f32 %v4791_v34, %v4719_v38  ;;  %v1255_v26 = vadd.f32 %v4799_v49, %v4721_v40  ;;  %v1260_v29 = vadd.f32 %v4786_v13, %v4723_v43  ;;  %v1263_v32 = vadd.f32 %v4795_v44, %v4725_v46 }
 0x22a   :  { %3837 = vmatmul.mubr.f32.gmra.mxu1 %v1199_v42  ;;  %3913 = vmatprep.subr.mxu1 %v1599_v22  ;;  %v1215_v45 = vadd.f32 %v3756_v41, %v4698_v12  ;;  %v3775_v52 = vpop.f32.mrf.mxu1  ;;  %v1268_v35 = vadd.f32 %v1267_v58, %v4727_v48  ;;  %v1271_v38 = vadd.f32 %v1270_v19, %v4729_v51  ;;  %v5234_v41 = vld [vmem:[#allocation22_spill] sm:$0xff]  ;;  %v3417_v19 = vld [vmem:[#allocation6 + $0x20] sm:$0xff]  }
 0x22b   :  { %v1206_v61 = vpop.f32.mrf.mxu0  ;;  %3839 = vmatprep.mubr.f32.mxu1 %v1204_v10  ;;  %3914 = vmatpush3.msra.mxu1 %v1599_v22  ;;  %v1276_v16 = vadd.f32 %v4802_v59, %v4731_v54  ;;  %v1279_v43 = vadd.f32 %v3772_v27, %v4733_v57  ;;  %v1292_v34 = vadd.f32 %v3775_v52, %v4739_v2  ;;  %v3415_v27 = vld [vmem:[#allocation6 + $0x10] sm:$0xff]   ;;  %v3336_v52 = vunpack.c.l.bf16 %v3417_v19 }
 0x22c   :  { %v1207_v28 = vadd.f32 %v1206_v61, %v4694_v6  ;;  %3915 = vmatprep.subr.mxu1 %v1598_v23  ;;  %v1594_v6 = vld [vmem:[#allocation8] sm:$0xff]  ;;  %v1283_v12 = vpop.f32.mrf.mxu1  ;;  %v5235_v61 = vld [vmem:[#allocation23_spill] sm:$0xff] }
 0x22d   :  { %3916 = vmatpush3.msra.mxu1 %v1598_v23  ;;  %v1284_v13 = vadd.f32 %v1283_v12, %v4735_v60 }
 0x22e   :  { %3840 = vmatmul.mubr.f32.gmra.mxu1 %v1207_v28  ;;  %3917 = vmatprep.subr.mxu1 %v1597_v37  ;;  %v3776_v30 = vpop.f32.mrf.mxu1 }
 0x22f   :  { %3842 = vmatprep.mubr.f32.mxu1 %v1212_v53  ;;  %3918 = vmatpush3.msra.mxu1 %v1597_v37  ;;  %v1295_v54 = vadd.f32 %v3776_v30, %v4741_v5  ;;  %v3414_v37 = vld [vmem:[#allocation6 + $0x8] sm:$0xff]  }
 0x230   :  { %3919 = vmatprep.subr.mxu1 %v1596_v0  ;;  %v1286_v21 = vpop.f32.mrf.mxu1  ;;  %v3325_v53 = vunpack.c.h.bf16 %v3414_v37 }
 0x231   :  { %3920 = vmatpush3.msra.mxu1 %v1596_v0  ;;  %v1287_v48 = vadd.f32 %v1286_v21, %v4737_v63  ;;  %v3328_v0 = vunpack.c.l.bf16 %v3415_v27 }
 0x232   :  { %3843 = vmatmul.mubr.f32.gmra.mxu1 %v1215_v45  ;;  %3921 = vmatprep.subr.mxu1 %v1595_v3  ;;  %v3779_v56 = vpop.f32.mrf.mxu1  ;;  %v3329_v45 = vunpack.c.h.bf16 %v3415_v27  ;;  %v3432_v27 = vld [vmem:[#allocation6 + $0x98] sm:$0xff]  }
 0x233   :  { %3845 = vmatprep.mubr.f32.mxu1 %v1220_v50  ;;  %3922 = vmatpush3.msra.mxu1 %v1595_v3  ;;  %v1308_v60 = vadd.f32 %v3779_v56, %v4747_v14  ;;  %v5232_v14 = vld [vmem:[#allocation20_spill] sm:$0xff]  ;;  %v3416_v3 = vld [vmem:[#allocation6 + $0x18] sm:$0xff]  }
 0x234   :  { %3923 = vmatprep.subr.mxu1 %v1594_v6  ;;  %v1299_v62 = vpop.f32.mrf.mxu1  ;;  %v3332_v50 = vunpack.c.l.bf16 %v3416_v3 }
 0x235   :  { %3924 = vmatpush3.msra.mxu1 %v1594_v6  ;;  %v1300_v44 = vadd.f32 %v1299_v62, %v4743_v8  ;;  %v3333_v6 = vunpack.c.h.bf16 %v3416_v3  ;;  %v3396_v3 = vunpack.c.l.bf16 %v3432_v27 }
 0x236   :  { %3846 = vmatmul.mubr.f32.gmra.mxu1 %v1223_v9  ;;  %v3780_v7 = vpop.f32.mrf.mxu1  ;;  %v3418_v9 = vld [vmem:[#allocation6 + $0x28] sm:$0xff]  }
 0x237   :  { %3848 = vmatprep.mubr.f32.mxu1 %v1228_v55  ;;  %v1311_v63 = vadd.f32 %v3780_v7, %v4749_v17  ;;  %v5233_v17 = vld [vmem:[#allocation21_spill] sm:$0xff]  ;;  %v3337_v55 = vunpack.c.h.bf16 %v3417_v19  ;;  %v3340_v12 = vunpack.c.l.bf16 %v3418_v9  ;;  %v2339_v19 = vld [vmem:[#allocation11] sm:$0xff] }
 0x238   :  { %v1302_v40 = vpop.f32.mrf.mxu1 }
 0x239   :  { %v1303_v57 = vadd.f32 %v1302_v40, %v4745_v11 }
 0x23a   :  { %3849 = vmatmul.mubr.f32.gmra.mxu1 %v1231_v15  ;;  %v3783_v33 = vpop.f32.mrf.mxu1  ;;  %v3419_v15 = vld [vmem:[#allocation6 + $0x30] sm:$0xff]  }
 0x23b   :  { %3851 = vmatprep.mubr.f32.mxu1 %v1236_v47  ;;  %v1324_v8 = vadd.f32 %v3783_v33, %v4755_v31  ;;  %v3341_v47 = vunpack.c.h.bf16 %v3418_v9  ;;  %v3344_v30 = vunpack.c.l.bf16 %v3419_v15  ;;  %v3425_v33 = vld [vmem:[#allocation6 + $0x60] sm:$0xff]   ;;  %v3434_v9 = vld [vmem:[#allocation6 + $0xa8] sm:$0xff]  }
 0x23c   :  { %v1315_v46 = vpop.f32.mrf.mxu1 }
 0x23d   :  { %v1316_v2 = vadd.f32 %v1315_v46, %v4751_v20  ;;  %v3319_v20 = vld [vmem:[#allocation6] sm:$0xff]   ;;  %v2354_v46 = vld [vmem:[#allocation11 + $0x78] sm:$0xff] }
 0x23e   :  { %3852 = vmatmul.mubr.f32.gmra.mxu1 %v1239_v18  ;;  %v3784_v51 = vpop.f32.mrf.mxu1  ;;  %v3321_v28 = vunpack.c.h.bf16 %v3319_v20  ;;  %v3420_v18 = vld [vmem:[#allocation6 + $0x38] sm:$0xff]   ;;  %3997 = vmatprep.subr.mxu0 %v2354_v46 }
 0x23f   :  { %3854 = vmatprep.mubr.f32.mxu1 %v1244_v1  ;;  %v1327_v11 = vadd.f32 %v3784_v51, %v4757_v36  ;;  %v3324_v36 = vunpack.c.l.bf16 %v3414_v37  ;;  %v3345_v1 = vunpack.c.h.bf16 %v3419_v15  ;;  %v3348_v21 = vunpack.c.l.bf16 %v3420_v18  ;;  %3998 = vmatpush3.msra.mxu0 %v2354_v46  ;;  %v3435_v15 = vld [vmem:[#allocation6 + $0xb0] sm:$0xff]  }
 0x240   :  { %v1318_v49 = vpop.f32.mrf.mxu1  ;;  %v3369_v51 = vunpack.c.h.bf16 %v3425_v33 }
 0x241   :  { %v1319_v5 = vadd.f32 %v1318_v49, %v4753_v25  ;;  %v3320_v25 = vunpack.c.l.bf16 %v3319_v20  ;;  %v3427_v49 = vld [vmem:[#allocation6 + $0x70] sm:$0xff]  }
 0x242   :  { %3855 = vmatmul.mubr.f32.gmra.mxu1 %v1247_v39  ;;  %v3787_v59 = vpop.f32.mrf.mxu1  ;;  %v3421_v39 = vld [vmem:[#allocation6 + $0x40] sm:$0xff]   ;;  %v2345_v20 = vld [vmem:[#allocation11 + $0x30] sm:$0xff] }
 0x243   :  { %3857 = vmatprep.mubr.f32.mxu1 %v1252_v24  ;;  %v1340_v23 = vadd.f32 %v3787_v59, %v5234_v41  ;;  %v3349_v24 = vunpack.c.h.bf16 %v3420_v18  ;;  %v3352_v56 = vunpack.c.l.bf16 %v3421_v39  ;;  %v3376_v59 = vunpack.c.l.bf16 %v3427_v49  ;;  %v3436_v18 = vld [vmem:[#allocation6 + $0xb8] sm:$0xff]  }
 0x244   :  { %v1331_v4 = vpop.f32.mrf.mxu1 }
 0x245   :  { %v1332_v42 = vadd.f32 %v1331_v4, %v5232_v14  ;;  %v2349_v4 = vld [vmem:[#allocation11 + $0x50] sm:$0xff]  ;;  %v2347_v14 = vld [vmem:[#allocation11 + $0x40] sm:$0xff] }
 0x246   :  { %3858 = vmatmul.mubr.f32.gmra.mxu1 %v1255_v26  ;;  %v3788_v22 = vpop.f32.mrf.mxu1  ;;  %v3422_v26 = vld [vmem:[#allocation6 + $0x48] sm:$0xff]  }
 0x247   :  { %3860 = vmatprep.mubr.f32.mxu1 %v1260_v29  ;;  %v1343_v31 = vadd.f32 %v3788_v22, %v5235_v61  ;;  %v3353_v29 = vunpack.c.h.bf16 %v3421_v39  ;;  %v3356_v62 = vunpack.c.l.bf16 %v3422_v26  ;;  %v2348_v22 = vld [vmem:[#allocation11 + $0x48] sm:$0xff]  ;;  %v3431_v61 = vld [vmem:[#allocation6 + $0x90] sm:$0xff]   ;;  %v3413_v39 = vunpack.c.h.bf16 %v3436_v18 }
 0x248   :  { %v1334_v10 = vpop.f32.mrf.mxu1 }
 0x249   :  { %v1335_v58 = vadd.f32 %v1334_v10, %v5233_v17  ;;  %v2346_v17 = vld [vmem:[#allocation11 + $0x38] sm:$0xff] }
 0x24a   :  { %3861 = vmatmul.mubr.f32.gmra.mxu1 %v1263_v32  ;;  %v3423_v32 = vld [vmem:[#allocation6 + $0x50] sm:$0xff]  }
 0x24b   :  { %3863 = vmatprep.mubr.f32.mxu1 %v1268_v35  ;;  %v3357_v35 = vunpack.c.h.bf16 %v3422_v26  ;;  %v3360_v7 = vunpack.c.l.bf16 %v3423_v32 }
 0x24e   :  { %3864 = vmatmul.mubr.f32.gmra.mxu1 %v1271_v38  ;;  %v3424_v38 = vld [vmem:[#allocation6 + $0x58] sm:$0xff]  }
 0x24f   :  { %3866 = vmatprep.mubr.f32.mxu1 %v1276_v16  ;;  %v3361_v16 = vunpack.c.h.bf16 %v3423_v32  ;;  %v3364_v40 = vunpack.c.l.bf16 %v3424_v38 }
 0x252   :  { %3867 = vmatmul.mubr.f32.gmra.mxu1 %v1279_v43  ;;  %v3365_v43 = vunpack.c.h.bf16 %v3424_v38 }
 0x253   :  { %3869 = vmatprep.mubr.f32.mxu1 %v1284_v13  ;;  %v3368_v13 = vunpack.c.l.bf16 %v3425_v33 }
 0x256   :  { %3870 = vmatmul.mubr.f32.gmra.mxu1 %v1287_v48  ;;  %v3426_v48 = vld [vmem:[#allocation6 + $0x68] sm:$0xff]  }
 0x257   :  { %3872 = vmatprep.mubr.f32.mxu1 %v1292_v34  ;;  %v2353_v34 = vld [vmem:[#allocation11 + $0x70] sm:$0xff] }
 0x258   :  { %3999 = vmatprep.subr.mxu0 %v2353_v34 }
 0x259   :  { %4000 = vmatpush3.msra.mxu0 %v2353_v34 }
 0x25a   :  { %3873 = vmatmul.mubr.f32.gmra.mxu1 %v1295_v54  ;;  %v3372_v54 = vunpack.c.l.bf16 %v3426_v48 }
 0x25b   :  { %3875 = vmatprep.mubr.f32.mxu1 %v1300_v44  ;;  %v2352_v44 = vld [vmem:[#allocation11 + $0x68] sm:$0xff] }
 0x25c   :  { %4001 = vmatprep.subr.mxu0 %v2352_v44 }
 0x25d   :  { %4002 = vmatpush3.msra.mxu0 %v2352_v44 }
 0x25e   :  { %3876 = vmatmul.mubr.f32.gmra.mxu1 %v1303_v57  ;;  %v2351_v57 = vld [vmem:[#allocation11 + $0x60] sm:$0xff] }
 0x25f   :  { %3878 = vmatprep.mubr.f32.mxu1 %v1308_v60  ;;  %v3373_v60 = vunpack.c.h.bf16 %v3426_v48  ;;  %4003 = vmatprep.subr.mxu0 %v2351_v57 }
 0x260   :  { %4004 = vmatpush3.msra.mxu0 %v2351_v57 }
 0x262   :  { %3879 = vmatmul.mubr.f32.gmra.mxu1 %v1311_v63  ;;  %v2350_v63 = vld [vmem:[#allocation11 + $0x58] sm:$0xff] }
 0x263   :  { %3881 = vmatprep.mubr.f32.mxu1 %v1316_v2  ;;  %v3428_v2 = vld [vmem:[#allocation6 + $0x78] sm:$0xff]   ;;  %4005 = vmatprep.subr.mxu0 %v2350_v63 }
 0x264   :  { %4006 = vmatpush3.msra.mxu0 %v2350_v63 }
 0x265   :  { %4007 = vmatprep.subr.mxu0 %v2349_v4 }
 0x266   :  { %3882 = vmatmul.mubr.f32.gmra.mxu1 %v1319_v5  ;;  %v3377_v5 = vunpack.c.h.bf16 %v3427_v49  ;;  %4008 = vmatpush3.msra.mxu0 %v2349_v4 }
 0x267   :  { %3884 = vmatprep.mubr.f32.mxu1 %v1324_v8  ;;  %v3380_v8 = vunpack.c.l.bf16 %v3428_v2  ;;  %4009 = vmatprep.subr.mxu0 %v2348_v22 }
 0x268   :  { %4010 = vmatpush3.msra.mxu0 %v2348_v22 }
 0x269   :  { %4011 = vmatprep.subr.mxu0 %v2347_v14 }
 0x26a   :  { %3885 = vmatmul.mubr.f32.gmra.mxu1 %v1327_v11  ;;  %v3429_v11 = vld [vmem:[#allocation6 + $0x80] sm:$0xff]   ;;  %4012 = vmatpush3.msra.mxu0 %v2347_v14 }
 0x26b   :  { %3887 = vmatprep.mubr.f32.mxu1 %v1332_v42  ;;  %v3381_v42 = vunpack.c.h.bf16 %v3428_v2  ;;  %v3384_v10 = vunpack.c.l.bf16 %v3429_v11  ;;  %4013 = vmatprep.subr.mxu0 %v2346_v17  ;;  %v3385_v41 = vunpack.c.h.bf16 %v3429_v11 }
 0x26c   :  { %4014 = vmatpush3.msra.mxu0 %v2346_v17 }
 0x26d   :  { %4015 = vmatprep.subr.mxu0 %v2345_v20 }
 0x26e   :  { %3888 = vmatmul.mubr.f32.gmra.mxu1 %v1335_v58  ;;  %v3430_v58 = vld [vmem:[#allocation6 + $0x88] sm:$0xff]   ;;  %4016 = vmatpush3.msra.mxu0 %v2345_v20  ;;  %v2833_v20 = vld [vmem:[#allocation12 + $0x78] sm:$0xff] }
 0x26f   :  { %3890 = vmatprep.mubr.f32.mxu1 %v1340_v23  ;;  %v3388_v23 = vunpack.c.l.bf16 %v3430_v58  ;;  %v3389_v37 = vunpack.c.h.bf16 %v3430_v58  ;;  %4101 = vmatprep.subr.mxu1 %v2833_v20 }
 0x272   :  { %3891 = vmatmul.mubr.f32.gmra.mxu1 %v1343_v31  ;;  %v2343_v31 = vld [vmem:[#allocation11 + $0x20] sm:$0xff] }
 0x273   :  { %3925 = vmatprep.mubr.f32.mxu1 %v3320_v25  ;;  %v2344_v25 = vld [vmem:[#allocation11 + $0x28] sm:$0xff] }
 0x274   :  { %4017 = vmatprep.subr.mxu0 %v2344_v25 }
 0x275   :  { %4018 = vmatpush3.msra.mxu0 %v2344_v25  ;;  %v2831_v25 = vld [vmem:[#allocation12 + $0x68] sm:$0xff] }
 0x276   :  { %3926 = vmatmul.mubr.f32.vlgmr.msra.gmra.mxu1 %v3321_v28  ;;  %4019 = vmatprep.subr.mxu0 %v2343_v31  ;;  %v3392_v28 = vunpack.c.l.bf16 %v3431_v61 }
 0x277   :  { %3928 = vmatprep.mubr.f32.mxu1 %v3324_v36  ;;  %4020 = vmatpush3.msra.mxu0 %v2343_v31  ;;  %v2342_v36 = vld [vmem:[#allocation11 + $0x18] sm:$0xff]  ;;  %v2830_v31 = vld [vmem:[#allocation12 + $0x60] sm:$0xff] }
 0x278   :  { %4021 = vmatprep.subr.mxu0 %v2342_v36  ;;  %4102 = vmatpush3.msra.mxu1 %v2833_v20 }
 0x279   :  { %4022 = vmatpush3.msra.mxu0 %v2342_v36 }
 0x27a   :  { %3929 = vmatmul.mubr.f32.gmra.mxu1 %v3325_v53  ;;  %v2341_v53 = vld [vmem:[#allocation11 + $0x10] sm:$0xff] }
 0x27b   :  { %3931 = vmatprep.mubr.f32.mxu1 %v3328_v0  ;;  %v3393_v0 = vunpack.c.h.bf16 %v3431_v61  ;;  %4023 = vmatprep.subr.mxu0 %v2341_v53 }
 0x27c   :  { %4024 = vmatpush3.msra.mxu0 %v2341_v53 }
 0x27e   :  { %3932 = vmatmul.mubr.f32.gmra.mxu1 %v3329_v45  ;;  %v2340_v45 = vld [vmem:[#allocation11 + $0x8] sm:$0xff] }
 0x27f   :  { %3934 = vmatprep.mubr.f32.mxu1 %v3332_v50  ;;  %v3433_v50 = vld [vmem:[#allocation6 + $0xa0] sm:$0xff]   ;;  %4025 = vmatprep.subr.mxu0 %v2340_v45 }
 0x280   :  { %4026 = vmatpush3.msra.mxu0 %v2340_v45  ;;  %v2826_v45 = vld [vmem:[#allocation12 + $0x40] sm:$0xff] }
 0x281   :  { %4027 = vmatprep.subr.mxu0 %v2339_v19 }
 0x282   :  { %3935 = vmatmul.mubr.f32.gmra.mxu1 %v3333_v6  ;;  %v3397_v6 = vunpack.c.h.bf16 %v3432_v27  ;;  %4028 = vmatpush3.msra.mxu0 %v2339_v19  ;;  %v2828_v27 = vld [vmem:[#allocation12 + $0x50] sm:$0xff]  ;;  %v2825_v19 = vld [vmem:[#allocation12 + $0x38] sm:$0xff] }
 0x283   :  { %3937 = vmatprep.mubr.f32.mxu1 %v3336_v52  ;;  %v3400_v52 = vunpack.c.l.bf16 %v3433_v50 }
 0x286   :  { %3938 = vmatmul.mubr.f32.gmra.mxu1 %v3337_v55  ;;  %v3401_v55 = vunpack.c.h.bf16 %v3433_v50 }
 0x287   :  { %3940 = vmatprep.mubr.f32.mxu1 %v3340_v12  ;;  %v3404_v12 = vunpack.c.l.bf16 %v3434_v9 }
 0x28a   :  { %3941 = vmatmul.mubr.f32.gmra.mxu1 %v3341_v47  ;;  %v3405_v47 = vunpack.c.h.bf16 %v3434_v9 }
 0x28b   :  { %3943 = vmatprep.mubr.f32.mxu1 %v3344_v30  ;;  %v3408_v30 = vunpack.c.l.bf16 %v3435_v15 }
 0x28e   :  { %3944 = vmatmul.mubr.f32.gmra.mxu1 %v3345_v1  ;;  %v3409_v1 = vunpack.c.h.bf16 %v3435_v15  ;;  %v2822_v15 = vld [vmem:[#allocation12 + $0x20] sm:$0xff] }
 0x28f   :  { %3946 = vmatprep.mubr.f32.mxu1 %v3348_v21  ;;  %v3412_v21 = vunpack.c.l.bf16 %v3436_v18 }
 0x292   :  { %3947 = vmatmul.mubr.f32.gmra.mxu1 %v3349_v24 }
 0x293   :  { %3949 = vmatprep.mubr.f32.mxu1 %v3352_v56 }
 0x296   :  { %3950 = vmatmul.mubr.f32.gmra.mxu1 %v3353_v29 }
 0x297   :  { %3952 = vmatprep.mubr.f32.mxu1 %v3356_v62 }
 0x29a   :  { %3953 = vmatmul.mubr.f32.gmra.mxu1 %v3357_v35 }
 0x29b   :  { %3955 = vmatprep.mubr.f32.mxu1 %v3360_v7 }
 0x29e   :  { %3956 = vmatmul.mubr.f32.gmra.mxu1 %v3361_v16 }
 0x29f   :  { %3958 = vmatprep.mubr.f32.mxu1 %v3364_v40 }
 0x2a2   :  { %3959 = vmatmul.mubr.f32.gmra.mxu1 %v3365_v43 }
 0x2a3   :  { %3961 = vmatprep.mubr.f32.mxu1 %v3368_v13 }
 0x2a6   :  { %3962 = vmatmul.mubr.f32.gmra.mxu1 %v3369_v51 }
 0x2a7   :  { %3964 = vmatprep.mubr.f32.mxu1 %v3372_v54 }
 0x2aa   :  { %3965 = vmatmul.mubr.f32.gmra.mxu1 %v3373_v60 }
 0x2ab   :  { %3967 = vmatprep.mubr.f32.mxu1 %v3376_v59 }
 0x2ae   :  { %3968 = vmatmul.mubr.f32.gmra.mxu1 %v3377_v5 }
 0x2af   :  { %3970 = vmatprep.mubr.f32.mxu1 %v3380_v8 }
 0x2b2   :  { %3971 = vmatmul.mubr.f32.gmra.mxu1 %v3381_v42 }
 0x2b3   :  { %3973 = vmatprep.mubr.f32.mxu1 %v3384_v10 }
 0x2b6   :  { %3974 = vmatmul.mubr.f32.gmra.mxu1 %v3385_v41  ;;  %v2832_v41 = vld [vmem:[#allocation12 + $0x70] sm:$0xff] }
 0x2b7   :  { %3976 = vmatprep.mubr.f32.mxu1 %v3388_v23  ;;  %4103 = vmatprep.subr.mxu1 %v2832_v41 }
 0x2b8   :  { %4104 = vmatpush3.msra.mxu1 %v2832_v41  ;;  %v4955_v41 = vld [vmem:[%s5221_s4] ss:$0 sm:$0xff] }
 0x2b9   :  { %4105 = vmatprep.subr.mxu1 %v2831_v25 }
 0x2ba   :  { %3977 = vmatmul.mubr.f32.gmra.mxu1 %v3389_v37 }
 0x2bb   :  { %3979 = vmatprep.mubr.f32.mxu1 %v3392_v28  ;;  %4106 = vmatpush3.msra.mxu1 %v2831_v25  ;;  %v2829_v28 = vld [vmem:[#allocation12 + $0x58] sm:$0xff] }
 0x2bc   :  { %4107 = vmatprep.subr.mxu1 %v2830_v31 }
 0x2bd   :  { %4108 = vmatpush3.msra.mxu1 %v2830_v31 }
 0x2be   :  { %3980 = vmatmul.mubr.f32.gmra.mxu1 %v3393_v0  ;;  %4109 = vmatprep.subr.mxu1 %v2829_v28  ;;  %v2827_v0 = vld [vmem:[#allocation12 + $0x48] sm:$0xff] }
 0x2bf   :  { %3982 = vmatprep.mubr.f32.mxu1 %v3396_v3  ;;  %4110 = vmatpush3.msra.mxu1 %v2829_v28 }
 0x2c0   :  { %4111 = vmatprep.subr.mxu1 %v2828_v27 }
 0x2c1   :  { %4112 = vmatpush3.msra.mxu1 %v2828_v27 }
 0x2c2   :  { %3983 = vmatmul.mubr.f32.gmra.mxu1 %v3397_v6  ;;  %4113 = vmatprep.subr.mxu1 %v2827_v0 }
 0x2c3   :  { %3985 = vmatprep.mubr.f32.mxu1 %v3400_v52  ;;  %4114 = vmatpush3.msra.mxu1 %v2827_v0  ;;  %v2824_v52 = vld [vmem:[#allocation12 + $0x30] sm:$0xff] }
 0x2c4   :  { %4115 = vmatprep.subr.mxu1 %v2826_v45 }
 0x2c5   :  { %4116 = vmatpush3.msra.mxu1 %v2826_v45 }
 0x2c6   :  { %3986 = vmatmul.mubr.f32.gmra.mxu1 %v3401_v55  ;;  %4117 = vmatprep.subr.mxu1 %v2825_v19  ;;  %v2823_v55 = vld [vmem:[#allocation12 + $0x28] sm:$0xff] }
 0x2c7   :  { %3988 = vmatprep.mubr.f32.mxu1 %v3404_v12  ;;  %4118 = vmatpush3.msra.mxu1 %v2825_v19 }
 0x2c8   :  { %4119 = vmatprep.subr.mxu1 %v2824_v52 }
 0x2c9   :  { %4120 = vmatpush3.msra.mxu1 %v2824_v52 }
 0x2ca   :  { %3989 = vmatmul.mubr.f32.gmra.mxu1 %v3405_v47  ;;  %4121 = vmatprep.subr.mxu1 %v2823_v55 }
 0x2cb   :  { %3991 = vmatprep.mubr.f32.mxu1 %v3408_v30  ;;  %4122 = vmatpush3.msra.mxu1 %v2823_v55  ;;  %v2821_v30 = vld [vmem:[#allocation12 + $0x18] sm:$0xff] }
 0x2cc   :  { %4123 = vmatprep.subr.mxu1 %v2822_v15 }
 0x2cd   :  { %4124 = vmatpush3.msra.mxu1 %v2822_v15 }
 0x2ce   :  { %3992 = vmatmul.mubr.f32.gmra.mxu1 %v3409_v1  ;;  %v2820_v1 = vld [vmem:[#allocation12 + $0x10] sm:$0xff]  ;;  %4125 = vmatprep.subr.mxu1 %v2821_v30 }
 0x2cf   :  { %3994 = vmatprep.mubr.f32.mxu1 %v3412_v21  ;;  %4126 = vmatpush3.msra.mxu1 %v2821_v30 }
 0x2d0   :  { %4127 = vmatprep.subr.mxu1 %v2820_v1 }
 0x2d1   :  { %4128 = vmatpush3.msra.mxu1 %v2820_v1 }
 0x2d2   :  { %3995 = vmatmul.mubr.f32.gmra.mxu1 %v3413_v39  ;;  %v2819_v39 = vld [vmem:[#allocation12 + $0x8] sm:$0xff] }
 0x2d3   :  { %4129 = vmatprep.subr.mxu1 %v2819_v39 }
 0x2d4   :  { %4130 = vmatpush3.msra.mxu1 %v2819_v39 }
 0x2d6   :  { %v4855_v24 = vpop.f32.mrf.mxu1 }
 0x2d8   :  { %v4857_v56 = vpop.f32.mrf.mxu1 }
 0x2da   :  { %v4859_v26 = vpop.f32.mrf.mxu1 }
 0x2dc   :  { %v4861_v29 = vpop.f32.mrf.mxu1 }
 0x2de   :  { %v4863_v62 = vpop.f32.mrf.mxu1 }
 0x2e0   :  { %v4865_v32 = vpop.f32.mrf.mxu1 }
 0x2e2   :  { %v4867_v35 = vpop.f32.mrf.mxu1 }
 0x2e4   :  { %v4869_v7 = vpop.f32.mrf.mxu1 }
 0x2e6   :  { %v4871_v38 = vpop.f32.mrf.mxu1 }
 0x2e8   :  { %v4873_v16 = vpop.f32.mrf.mxu1 }
 0x2ea   :  { %v4875_v40 = vpop.f32.mrf.mxu1 }
 0x2ec   :  { %v4877_v33 = vpop.f32.mrf.mxu1 }
 0x2ee   :  { %v4879_v43 = vpop.f32.mrf.mxu1 }
 0x2f0   :  { %v4881_v13 = vpop.f32.mrf.mxu1 }
 0x2f2   :  { %v4883_v46 = vpop.f32.mrf.mxu1 }
 0x2f4   :  { %v4885_v48 = vpop.f32.mrf.mxu1 }
 0x2f6   :  { %v4887_v34 = vpop.f32.mrf.mxu1 }
 0x2f8   :  { %v4889_v51 = vpop.f32.mrf.mxu1 }
 0x2fa   :  { %v4891_v54 = vpop.f32.mrf.mxu1 }
 0x2fc   :  { %v4893_v44 = vpop.f32.mrf.mxu1 }
 0x2fe   :  { %v4895_v49 = vpop.f32.mrf.mxu1 }
 0x300   :  { %v4897_v57 = vpop.f32.mrf.mxu1 }
 0x302   :  { %v4899_v60 = vpop.f32.mrf.mxu1 }
 0x304   :  { %v4901_v59 = vpop.f32.mrf.mxu1 }
 0x306   :  { %v4903_v63 = vpop.f32.mrf.mxu1 }
 0x308   :  { %v4905_v2 = vpop.f32.mrf.mxu1 }
 0x30a   :  { %v4907_v4 = vpop.f32.mrf.mxu1 }
 0x30c   :  { %v4909_v5 = vpop.f32.mrf.mxu1 }
 0x30e   :  { %v4911_v8 = vpop.f32.mrf.mxu1 }
 0x310   :  { %v4913_v22 = vpop.f32.mrf.mxu1 }
 0x312   :  { %v4915_v11 = vpop.f32.mrf.mxu1 }
 0x314   :  { %v4917_v14 = vpop.f32.mrf.mxu1 }
 0x316   :  { %v4919_v42 = vpop.f32.mrf.mxu1 }
 0x318   :  { %v4921_v10 = vpop.f32.mrf.mxu1 }
 0x31a   :  { %v4923_v17 = vpop.f32.mrf.mxu1 }
 0x31c   :  { %v4925_v58 = vpop.f32.mrf.mxu1 }
 0x31e   :  { %v4927_v23 = vpop.f32.mrf.mxu1 }
 0x320   :  { %v4929_v61 = vpop.f32.mrf.mxu1 }
 0x322   :  { %v4931_v37 = vpop.f32.mrf.mxu1 }
 0x324   :  { %v4933_v36 = vpop.f32.mrf.mxu1 }
 0x326   :  { %v4935_v53 = vpop.f32.mrf.mxu1 }
 0x328   :  { %v4937_v3 = vpop.f32.mrf.mxu1 }
 0x32a   :  { %v4939_v50 = vpop.f32.mrf.mxu1 }
 0x32c   :  { %v4941_v6 = vpop.f32.mrf.mxu1 }
 0x32e   :  { %v4943_v9 = vpop.f32.mrf.mxu1 }
 0x330   :  { %v4945_v12 = vpop.f32.mrf.mxu1 }
 0x332   :  { %v4947_v47 = vpop.f32.mrf.mxu1 }
 0x334   :  { %v4949_v18 = vpop.f32.mrf.mxu1 }
 0x336   :  { %v3927_v21 = vpop.f32.mrf.mxu1 }
 0x337   :  { %v2003_v20 = vadd.f32 %v3927_v21, %v4855_v24 }
 0x338   :  { %v1997_v25 = vpop.f32.mrf.mxu1 }
 0x339   :  { %v1998_v31 = vadd.f32 %v1997_v25, %v4857_v56  ;;  %v2244_v28 = vadd.f32 %v4955_v41, %v2003_v20 }
 0x33a   :  { %v3930_v27 = vpop.f32.mrf.mxu1 }
 0x33b   :  { %v2243_v0 = vadd.f32 %v4955_v41, %v1998_v31  ;;  %v2013_v45 = vadd.f32 %v3930_v27, %v4859_v26  ;;  %v2292_v55 = vmax.f32 %v2244_v28, 0.0 }
 0x33c   :  { %v2007_v24 = vpop.f32.mrf.mxu1 }
 0x33d   :  { %v2291_v19 = vmax.f32 %v2243_v0, 0.0  ;;  %v2008_v52 = vadd.f32 %v2007_v24, %v4861_v29  ;;  %v2246_v15 = vadd.f32 %v4955_v41, %v2013_v45 }
 0x33e   :  { %v3933_v30 = vpop.f32.mrf.mxu1 }
 0x33f   :  { %v2245_v1 = vadd.f32 %v4955_v41, %v2008_v52  ;;  %v2023_v56 = vadd.f32 %v3933_v30, %v4863_v62  ;;  %4029 = vmatprep.mubr.f32.mxu0 %v2291_v19  ;;  %v2294_v25 = vmax.f32 %v2246_v15, 0.0 }
 0x340   :  { %v2017_v21 = vpop.f32.mrf.mxu1  ;;  %4030 = vmatmul.mubr.f32.vlgmr.msra.gmra.mxu0 %v2292_v55 }
 0x341   :  { %v2293_v39 = vmax.f32 %v2245_v1, 0.0  ;;  %v2018_v20 = vadd.f32 %v2017_v21, %v4865_v32  ;;  %v2248_v26 = vadd.f32 %v4955_v41, %v2023_v56 }
 0x342   :  { %v3936_v31 = vpop.f32.mrf.mxu1 }
 0x343   :  { %v2247_v29 = vadd.f32 %v4955_v41, %v2018_v20  ;;  %v2033_v28 = vadd.f32 %v3936_v31, %v4867_v35  ;;  %4032 = vmatprep.mubr.f32.mxu0 %v2293_v39  ;;  %v2296_v45 = vmax.f32 %v2248_v26, 0.0 }
 0x344   :  { %v2027_v27 = vpop.f32.mrf.mxu1  ;;  %4033 = vmatmul.mubr.f32.gmra.mxu0 %v2294_v25 }
 0x345   :  { %v2295_v0 = vmax.f32 %v2247_v29, 0.0  ;;  %v2028_v62 = vadd.f32 %v2027_v27, %v4869_v7  ;;  %v2250_v24 = vadd.f32 %v4955_v41, %v2033_v28 }
 0x346   :  { %v3939_v19 = vpop.f32.mrf.mxu1 }
 0x347   :  { %v2249_v32 = vadd.f32 %v4955_v41, %v2028_v62  ;;  %v2043_v52 = vadd.f32 %v3939_v19, %v4871_v38  ;;  %4035 = vmatprep.mubr.f32.mxu0 %v2295_v0  ;;  %v2298_v30 = vmax.f32 %v2250_v24, 0.0 }
 0x348   :  { %v2037_v55 = vpop.f32.mrf.mxu1  ;;  %4036 = vmatmul.mubr.f32.gmra.mxu0 %v2296_v45 }
 0x349   :  { %v2297_v15 = vmax.f32 %v2249_v32, 0.0  ;;  %v2038_v35 = vadd.f32 %v2037_v55, %v4873_v16  ;;  %v2252_v1 = vadd.f32 %v4955_v41, %v2043_v52 }
 0x34a   :  { %v3942_v56 = vpop.f32.mrf.mxu1 }
 0x34b   :  { %v2251_v7 = vadd.f32 %v4955_v41, %v2038_v35  ;;  %v2053_v21 = vadd.f32 %v3942_v56, %v4875_v40  ;;  %4038 = vmatprep.mubr.f32.mxu0 %v2297_v15  ;;  %v2300_v25 = vmax.f32 %v2252_v1, 0.0 }
 0x34c   :  { %v2047_v39 = vpop.f32.mrf.mxu1  ;;  %4039 = vmatmul.mubr.f32.gmra.mxu0 %v2298_v30 }
 0x34d   :  { %v2299_v20 = vmax.f32 %v2251_v7, 0.0  ;;  %v2048_v38 = vadd.f32 %v2047_v39, %v4877_v33  ;;  %v2254_v26 = vadd.f32 %v4955_v41, %v2053_v21 }
 0x34e   :  { %v3945_v31 = vpop.f32.mrf.mxu1 }
 0x34f   :  { %v2253_v16 = vadd.f32 %v4955_v41, %v2048_v38  ;;  %v2063_v29 = vadd.f32 %v3945_v31, %v4879_v43  ;;  %4041 = vmatprep.mubr.f32.mxu0 %v2299_v20  ;;  %v2302_v0 = vmax.f32 %v2254_v26, 0.0 }
 0x350   :  { %v2057_v28 = vpop.f32.mrf.mxu1  ;;  %4042 = vmatmul.mubr.f32.gmra.mxu0 %v2300_v25 }
 0x351   :  { %v2301_v27 = vmax.f32 %v2253_v16, 0.0  ;;  %v2058_v40 = vadd.f32 %v2057_v28, %v4881_v13  ;;  %v2256_v62 = vadd.f32 %v4955_v41, %v2063_v29 }
 0x352   :  { %v3948_v45 = vpop.f32.mrf.mxu1 }
 0x353   :  { %v2255_v33 = vadd.f32 %v4955_v41, %v2058_v40  ;;  %v2073_v24 = vadd.f32 %v3948_v45, %v4883_v46  ;;  %4044 = vmatprep.mubr.f32.mxu0 %v2301_v27  ;;  %v2304_v52 = vmax.f32 %v2256_v62, 0.0 }
 0x354   :  { %v2067_v19 = vpop.f32.mrf.mxu1  ;;  %4045 = vmatmul.mubr.f32.gmra.mxu0 %v2302_v0 }
 0x355   :  { %v2303_v32 = vmax.f32 %v2255_v33, 0.0  ;;  %v2068_v43 = vadd.f32 %v2067_v19, %v4885_v48  ;;  %v2258_v55 = vadd.f32 %v4955_v41, %v2073_v24 }
 0x356   :  { %v3951_v15 = vpop.f32.mrf.mxu1 }
 0x357   :  { %v2257_v13 = vadd.f32 %v4955_v41, %v2068_v43  ;;  %v2083_v35 = vadd.f32 %v3951_v15, %v4887_v34  ;;  %4047 = vmatprep.mubr.f32.mxu0 %v2303_v32  ;;  %v2306_v56 = vmax.f32 %v2258_v55, 0.0 }
 0x358   :  { %v2077_v30 = vpop.f32.mrf.mxu1  ;;  %4048 = vmatmul.mubr.f32.gmra.mxu0 %v2304_v52 }
 0x359   :  { %v2305_v1 = vmax.f32 %v2257_v13, 0.0  ;;  %v2078_v46 = vadd.f32 %v2077_v30, %v4889_v51  ;;  %v2260_v7 = vadd.f32 %v4955_v41, %v2083_v35 }
 0x35a   :  { %v3954_v21 = vpop.f32.mrf.mxu1 }
 0x35b   :  { %v2259_v48 = vadd.f32 %v4955_v41, %v2078_v46  ;;  %v2093_v39 = vadd.f32 %v3954_v21, %v4891_v54  ;;  %4050 = vmatprep.mubr.f32.mxu0 %v2305_v1  ;;  %v2308_v25 = vmax.f32 %v2260_v7, 0.0 }
 0x35c   :  { %v2087_v20 = vpop.f32.mrf.mxu1  ;;  %4051 = vmatmul.mubr.f32.gmra.mxu0 %v2306_v56 }
 0x35d   :  { %v2307_v38 = vmax.f32 %v2259_v48, 0.0  ;;  %v2088_v34 = vadd.f32 %v2087_v20, %v4893_v44  ;;  %v2262_v26 = vadd.f32 %v4955_v41, %v2093_v39 }
 0x35e   :  { %v3957_v31 = vpop.f32.mrf.mxu1 }
 0x35f   :  { %v2261_v51 = vadd.f32 %v4955_v41, %v2088_v34  ;;  %v2103_v16 = vadd.f32 %v3957_v31, %v4895_v49  ;;  %4053 = vmatprep.mubr.f32.mxu0 %v2307_v38  ;;  %v2310_v27 = vmax.f32 %v2262_v26, 0.0 }
 0x360   :  { %v2097_v29 = vpop.f32.mrf.mxu1  ;;  %4054 = vmatmul.mubr.f32.gmra.mxu0 %v2308_v25 }
 0x361   :  { %v2309_v28 = vmax.f32 %v2261_v51, 0.0  ;;  %v2098_v54 = vadd.f32 %v2097_v29, %v4897_v57  ;;  %v2264_v40 = vadd.f32 %v4955_v41, %v2103_v16 }
 0x362   :  { %v3960_v0 = vpop.f32.mrf.mxu1 }
 0x363   :  { %v2263_v44 = vadd.f32 %v4955_v41, %v2098_v54  ;;  %v2113_v62 = vadd.f32 %v3960_v0, %v4899_v60  ;;  %4056 = vmatprep.mubr.f32.mxu0 %v2309_v28  ;;  %v2312_v24 = vmax.f32 %v2264_v40, 0.0 }
 0x364   :  { %v2107_v45 = vpop.f32.mrf.mxu1  ;;  %4057 = vmatmul.mubr.f32.gmra.mxu0 %v2310_v27 }
 0x365   :  { %v2311_v33 = vmax.f32 %v2263_v44, 0.0  ;;  %v2108_v49 = vadd.f32 %v2107_v45, %v4901_v59  ;;  %v2266_v19 = vadd.f32 %v4955_v41, %v2113_v62 }
 0x366   :  { %v3963_v32 = vpop.f32.mrf.mxu1 }
 0x367   :  { %v2265_v57 = vadd.f32 %v4955_v41, %v2108_v49  ;;  %v2123_v43 = vadd.f32 %v3963_v32, %v4903_v63  ;;  %4059 = vmatprep.mubr.f32.mxu0 %v2311_v33  ;;  %v2314_v15 = vmax.f32 %v2266_v19, 0.0 }
 0x368   :  { %v2117_v52 = vpop.f32.mrf.mxu1  ;;  %4060 = vmatmul.mubr.f32.gmra.mxu0 %v2312_v24 }
 0x369   :  { %v2313_v55 = vmax.f32 %v2265_v57, 0.0  ;;  %v2118_v60 = vadd.f32 %v2117_v52, %v4905_v2  ;;  %v2268_v13 = vadd.f32 %v4955_v41, %v2123_v43 }
 0x36a   :  { %v3966_v35 = vpop.f32.mrf.mxu1 }
 0x36b   :  { %v2267_v59 = vadd.f32 %v4955_v41, %v2118_v60  ;;  %v2133_v30 = vadd.f32 %v3966_v35, %v4907_v4  ;;  %4062 = vmatprep.mubr.f32.mxu0 %v2313_v55  ;;  %v2316_v56 = vmax.f32 %v2268_v13, 0.0 }
 0x36c   :  { %v2127_v1 = vpop.f32.mrf.mxu1  ;;  %4063 = vmatmul.mubr.f32.gmra.mxu0 %v2314_v15 }
 0x36d   :  { %v2315_v46 = vmax.f32 %v2267_v59, 0.0  ;;  %v2128_v63 = vadd.f32 %v2127_v1, %v4909_v5  ;;  %v2270_v7 = vadd.f32 %v4955_v41, %v2133_v30  ;;  %v2818_v30 = vld [vmem:[#allocation12] sm:$0xff] }
 0x36e   :  { %v3969_v21 = vpop.f32.mrf.mxu1  ;;  %4131 = vmatprep.subr.mxu1 %v2818_v30 }
 0x36f   :  { %v2269_v2 = vadd.f32 %v4955_v41, %v2128_v63  ;;  %v2143_v48 = vadd.f32 %v3969_v21, %v4911_v8  ;;  %4065 = vmatprep.mubr.f32.mxu0 %v2315_v46  ;;  %v2318_v38 = vmax.f32 %v2270_v7, 0.0  ;;  %4132 = vmatpush3.msra.mxu1 %v2818_v30 }
 0x370   :  { %v2137_v39 = vpop.f32.mrf.mxu1  ;;  %4066 = vmatmul.mubr.f32.gmra.mxu0 %v2316_v56 }
 0x371   :  { %v2317_v20 = vmax.f32 %v2269_v2, 0.0  ;;  %v2138_v4 = vadd.f32 %v2137_v39, %v4913_v22  ;;  %v2272_v34 = vadd.f32 %v4955_v41, %v2143_v48 }
 0x372   :  { %v3972_v25 = vpop.f32.mrf.mxu1 }
 0x373   :  { %v2271_v5 = vadd.f32 %v4955_v41, %v2138_v4  ;;  %v2153_v26 = vadd.f32 %v3972_v25, %v4915_v11  ;;  %4068 = vmatprep.mubr.f32.mxu0 %v2317_v20  ;;  %v2320_v16 = vmax.f32 %v2272_v34, 0.0 }
 0x374   :  { %v2147_v31 = vpop.f32.mrf.mxu1  ;;  %4069 = vmatmul.mubr.f32.gmra.mxu0 %v2318_v38 }
 0x375   :  { %v2319_v51 = vmax.f32 %v2271_v5, 0.0  ;;  %v2148_v8 = vadd.f32 %v2147_v31, %v4917_v14  ;;  %v2274_v29 = vadd.f32 %v4955_v41, %v2153_v26 }
 0x376   :  { %v3975_v28 = vpop.f32.mrf.mxu1 }
 0x377   :  { %v2273_v22 = vadd.f32 %v4955_v41, %v2148_v8  ;;  %v2163_v54 = vadd.f32 %v3975_v28, %v4919_v42  ;;  %4071 = vmatprep.mubr.f32.mxu0 %v2319_v51  ;;  %v2322_v0 = vmax.f32 %v2274_v29, 0.0 }
 0x378   :  { %v2157_v27 = vpop.f32.mrf.mxu1  ;;  %4072 = vmatmul.mubr.f32.gmra.mxu0 %v2320_v16 }
 0x379   :  { %v2321_v40 = vmax.f32 %v2273_v22, 0.0  ;;  %v2158_v11 = vadd.f32 %v2157_v27, %v4921_v10  ;;  %v2276_v44 = vadd.f32 %v4955_v41, %v2163_v54 }
 0x37a   :  { %v3978_v62 = vpop.f32.mrf.mxu1 }
 0x37b   :  { %v2275_v14 = vadd.f32 %v4955_v41, %v2158_v11  ;;  %v2173_v45 = vadd.f32 %v3978_v62, %v4923_v17  ;;  %4074 = vmatprep.mubr.f32.mxu0 %v2321_v40  ;;  %v2324_v24 = vmax.f32 %v2276_v44, 0.0 }
 0x37c   :  { %v2167_v33 = vpop.f32.mrf.mxu1  ;;  %4075 = vmatmul.mubr.f32.gmra.mxu0 %v2322_v0 }
 0x37d   :  { %v2323_v49 = vmax.f32 %v2275_v14, 0.0  ;;  %v2168_v42 = vadd.f32 %v2167_v33, %v4925_v58  ;;  %v2278_v19 = vadd.f32 %v4955_v41, %v2173_v45 }
 0x37e   :  { %v3981_v32 = vpop.f32.mrf.mxu1 }
 0x37f   :  { %v2277_v10 = vadd.f32 %v4955_v41, %v2168_v42  ;;  %v2183_v57 = vadd.f32 %v3981_v32, %v4927_v23  ;;  %4077 = vmatprep.mubr.f32.mxu0 %v2323_v49  ;;  %v2326_v55 = vmax.f32 %v2278_v19, 0.0 }
 0x380   :  { %v2177_v43 = vpop.f32.mrf.mxu1  ;;  %4078 = vmatmul.mubr.f32.gmra.mxu0 %v2324_v24 }
 0x381   :  { %v2325_v52 = vmax.f32 %v2277_v10, 0.0  ;;  %v2178_v17 = vadd.f32 %v2177_v43, %v4929_v61  ;;  %v2280_v60 = vadd.f32 %v4955_v41, %v2183_v57 }
 0x382   :  { %v3984_v15 = vpop.f32.mrf.mxu1 }
 0x383   :  { %v2279_v58 = vadd.f32 %v4955_v41, %v2178_v17  ;;  %v2193_v13 = vadd.f32 %v3984_v15, %v4931_v37  ;;  %4080 = vmatprep.mubr.f32.mxu0 %v2325_v52  ;;  %v2328_v1 = vmax.f32 %v2280_v60, 0.0 }
 0x384   :  { %v2187_v35 = vpop.f32.mrf.mxu1  ;;  %4081 = vmatmul.mubr.f32.gmra.mxu0 %v2326_v55 }
 0x385   :  { %v2327_v59 = vmax.f32 %v2279_v58, 0.0  ;;  %v2188_v23 = vadd.f32 %v2187_v35, %v4933_v36  ;;  %v2282_v46 = vadd.f32 %v4955_v41, %v2193_v13 }
 0x386   :  { %v3987_v63 = vpop.f32.mrf.mxu1 }
 0x387   :  { %v2281_v61 = vadd.f32 %v4955_v41, %v2188_v23  ;;  %v2203_v56 = vadd.f32 %v3987_v63, %v4935_v53  ;;  %4083 = vmatprep.mubr.f32.mxu0 %v2327_v59  ;;  %v2330_v2 = vmax.f32 %v2282_v46, 0.0 }
 0x388   :  { %v2197_v7 = vpop.f32.mrf.mxu1  ;;  %4084 = vmatmul.mubr.f32.gmra.mxu0 %v2328_v1 }
 0x389   :  { %v2329_v37 = vmax.f32 %v2281_v61, 0.0  ;;  %v2198_v21 = vadd.f32 %v2197_v7, %v4937_v3  ;;  %v2284_v36 = vadd.f32 %v4955_v41, %v2203_v56 }
 0x38a   :  { %v3990_v48 = vpop.f32.mrf.mxu1 }
 0x38b   :  { %v2283_v39 = vadd.f32 %v4955_v41, %v2198_v21  ;;  %v2213_v20 = vadd.f32 %v3990_v48, %v4939_v50  ;;  %4086 = vmatprep.mubr.f32.mxu0 %v2329_v37  ;;  %v2332_v34 = vmax.f32 %v2284_v36, 0.0 }
 0x38c   :  { %v2207_v4 = vpop.f32.mrf.mxu1  ;;  %4087 = vmatmul.mubr.f32.gmra.mxu0 %v2330_v2 }
 0x38d   :  { %v2331_v38 = vmax.f32 %v2283_v39, 0.0  ;;  %v2208_v53 = vadd.f32 %v2207_v4, %v4941_v6  ;;  %v2286_v25 = vadd.f32 %v4955_v41, %v2213_v20 }
 0x38e   :  { %v3993_v5 = vpop.f32.mrf.mxu1 }
 0x38f   :  { %v2285_v3 = vadd.f32 %v4955_v41, %v2208_v53  ;;  %v2223_v26 = vadd.f32 %v3993_v5, %v4943_v9  ;;  %4089 = vmatprep.mubr.f32.mxu0 %v2331_v38  ;;  %v2334_v8 = vmax.f32 %v2286_v25, 0.0 }
 0x390   :  { %v2217_v31 = vpop.f32.mrf.mxu1  ;;  %4090 = vmatmul.mubr.f32.gmra.mxu0 %v2332_v34 }
 0x391   :  { %v2333_v51 = vmax.f32 %v2285_v3, 0.0  ;;  %v2218_v50 = vadd.f32 %v2217_v31, %v4945_v12  ;;  %v2288_v16 = vadd.f32 %v4955_v41, %v2223_v26 }
 0x392   :  { %v3996_v29 = vpop.f32.mrf.mxu1 }
 0x393   :  { %v2287_v6 = vadd.f32 %v4955_v41, %v2218_v50  ;;  %v2233_v28 = vadd.f32 %v3996_v29, %v4947_v47  ;;  %4092 = vmatprep.mubr.f32.mxu0 %v2333_v51  ;;  %v2336_v27 = vmax.f32 %v2288_v16, 0.0  ;;  %v5055_v47 = vld [vmem:[%s5223_s6] ss:$0 sm:$0xff] }
 0x394   :  { %v2227_v22 = vpop.f32.mrf.mxu1  ;;  %4093 = vmatmul.mubr.f32.gmra.mxu0 %v2334_v8 }
 0x395   :  { %v2335_v54 = vmax.f32 %v2287_v6, 0.0  ;;  %v2228_v9 = vadd.f32 %v2227_v22, %v4949_v18  ;;  %v2290_v40 = vadd.f32 %v4955_v41, %v2233_v28  ;;  %v5061_v18 = vld [vmem:[%s5224_s7] ss:$0 sm:$0xff] }
 0x397   :  { %v2289_v11 = vadd.f32 %v4955_v41, %v2228_v9  ;;  %4095 = vmatprep.mubr.f32.mxu0 %v2335_v54  ;;  %v2338_v0 = vmax.f32 %v2290_v40, 0.0 }
 0x398   :  { %4096 = vmatmul.mubr.f32.gmra.mxu0 %v2336_v27 }
 0x399   :  { %v2337_v12 = vmax.f32 %v2289_v11, 0.0 }
 0x39b   :  { %4098 = vmatprep.mubr.f32.mxu0 %v2337_v12 }
 0x39c   :  { %4099 = vmatmul.mubr.f32.gmra.mxu0 %v2338_v0 }
 0x400   :  { %v4031_v44 = vpop.f32.mrf.mxu0 }
 0x401   :  { %v2434_v62 = vadd.f32 %v4031_v44, %v5055_v47 }
 0x402   :  { %v2428_v41 = vpop.f32.mrf.mxu0 }
 0x403   :  { %v2429_v14 = vadd.f32 %v5055_v47, %v2428_v41  ;;  %v2723_v45 = vmul.f32 %v5061_v18, %v2434_v62  ;;  %vm2668_vm0 = vcmp.gt.f32.partialorder %v2434_v62, 0.0 }
 0x404   :  { %v4034_v33 = vpop.f32.mrf.mxu0 }
 0x405   :  { %v2722_v49 = vmul.f32 %v5061_v18, %v2429_v14  ;;  %v2444_v42 = vadd.f32 %v4034_v33, %v5055_v47  ;;  %vm2667_vm1 = vcmp.gt.f32.partialorder %v2429_v14, 0.0  ;;  %v2771_v10 = vsel %vm2668_vm0, %v2434_v62, %v2723_v45 }
 0x406   :  { %v2438_v24 = vpop.f32.mrf.mxu0 }
 0x407   :  { %v2439_v19 = vadd.f32 %v5055_v47, %v2438_v24  ;;  %v2770_v32 = vsel %vm2667_vm1, %v2429_v14, %v2722_v49  ;;  %v2725_v57 = vmul.f32 %v5061_v18, %v2444_v42  ;;  %vm2670_vm2 = vcmp.gt.f32.partialorder %v2444_v42, 0.0 }
 0x408   :  { %v4037_v43 = vpop.f32.mrf.mxu0  ;;  %4133 = vmatprep.mubr.f32.mxu1 %v2770_v32 }
 0x409   :  { %v2724_v52 = vmul.f32 %v5061_v18, %v2439_v19  ;;  %v2454_v17 = vadd.f32 %v4037_v43, %v5055_v47  ;;  %4134 = vmatmul.mubr.f32.vlgmr.msra.gmra.mxu1 %v2771_v10  ;;  %vm2669_vm3 = vcmp.gt.f32.partialorder %v2439_v19, 0.0  ;;  %v2773_v35 = vsel %vm2670_vm2, %v2444_v42, %v2725_v57 }
 0x40a   :  { %v2448_v55 = vpop.f32.mrf.mxu0 }
 0x40b   :  { %v2449_v60 = vadd.f32 %v5055_v47, %v2448_v55  ;;  %v2772_v15 = vsel %vm2669_vm3, %v2439_v19, %v2724_v52  ;;  %v2727_v58 = vmul.f32 %v5061_v18, %v2454_v17  ;;  %vm2672_vm4 = vcmp.gt.f32.partialorder %v2454_v17, 0.0 }
 0x40c   :  { %v4040_v13 = vpop.f32.mrf.mxu0  ;;  %4136 = vmatprep.mubr.f32.mxu1 %v2772_v15 }
 0x40d   :  { %v2726_v59 = vmul.f32 %v5061_v18, %v2449_v60  ;;  %v2464_v23 = vadd.f32 %v4040_v13, %v5055_v47  ;;  %4137 = vmatmul.mubr.f32.gmra.mxu1 %v2773_v35  ;;  %vm2671_vm5 = vcmp.gt.f32.partialorder %v2449_v60, 0.0  ;;  %v2775_v56 = vsel %vm2672_vm4, %v2454_v17, %v2727_v58 }
 0x40e   :  { %v2458_v30 = vpop.f32.mrf.mxu0 }
 0x40f   :  { %v2459_v1 = vadd.f32 %v5055_v47, %v2458_v30  ;;  %v2774_v46 = vsel %vm2671_vm5, %v2449_v60, %v2726_v59  ;;  %v2729_v63 = vmul.f32 %v5061_v18, %v2464_v23  ;;  %vm2674_vm6 = vcmp.gt.f32.partialorder %v2464_v23, 0.0 }
 0x410   :  { %v4043_v61 = vpop.f32.mrf.mxu0  ;;  %4139 = vmatprep.mubr.f32.mxu1 %v2774_v46 }
 0x411   :  { %v2728_v7 = vmul.f32 %v5061_v18, %v2459_v1  ;;  %v2474_v37 = vadd.f32 %v4043_v61, %v5055_v47  ;;  %4140 = vmatmul.mubr.f32.gmra.mxu1 %v2775_v56  ;;  %vm2673_vm7 = vcmp.gt.f32.partialorder %v2459_v1, 0.0  ;;  %v2777_v20 = vsel %vm2674_vm6, %v2464_v23, %v2729_v63 }
 0x412   :  { %v2468_v21 = vpop.f32.mrf.mxu0 }
 0x413   :  { %v2469_v2 = vadd.f32 %v5055_v47, %v2468_v21  ;;  %v2776_v36 = vsel %vm2673_vm7, %v2459_v1, %v2728_v7  ;;  %v2731_v48 = vmul.f32 %v5061_v18, %v2474_v37  ;;  %vm2676_vm8 = vcmp.gt.f32.partialorder %v2474_v37, 0.0 }
 0x414   :  { %v4046_v39 = vpop.f32.mrf.mxu0  ;;  %4142 = vmatprep.mubr.f32.mxu1 %v2776_v36 }
 0x415   :  { %v2730_v4 = vmul.f32 %v5061_v18, %v2469_v2  ;;  %v2484_v38 = vadd.f32 %v4046_v39, %v5055_v47  ;;  %4143 = vmatmul.mubr.f32.gmra.mxu1 %v2777_v20  ;;  %vm2675_vm9 = vcmp.gt.f32.partialorder %v2469_v2, 0.0  ;;  %v2779_v26 = vsel %vm2676_vm8, %v2474_v37, %v2731_v48 }
 0x416   :  { %v2478_v53 = vpop.f32.mrf.mxu0 }
 0x417   :  { %v2479_v34 = vadd.f32 %v5055_v47, %v2478_v53  ;;  %v2778_v25 = vsel %vm2675_vm9, %v2469_v2, %v2730_v4  ;;  %v2733_v5 = vmul.f32 %v5061_v18, %v2484_v38  ;;  %vm2678_vm10 = vcmp.gt.f32.partialorder %v2484_v38, 0.0 }
 0x418   :  { %v4049_v3 = vpop.f32.mrf.mxu0  ;;  %4145 = vmatprep.mubr.f32.mxu1 %v2778_v25 }
 0x419   :  { %v2732_v31 = vmul.f32 %v5061_v18, %v2479_v34  ;;  %v2494_v51 = vadd.f32 %v4049_v3, %v5055_v47  ;;  %4146 = vmatmul.mubr.f32.gmra.mxu1 %v2779_v26  ;;  %vm2677_vm11 = vcmp.gt.f32.partialorder %v2479_v34, 0.0  ;;  %v2781_v28 = vsel %vm2678_vm10, %v2484_v38, %v2733_v5 }
 0x41a   :  { %v2488_v50 = vpop.f32.mrf.mxu0 }
 0x41b   :  { %v2489_v8 = vadd.f32 %v5055_v47, %v2488_v50  ;;  %v2780_v16 = vsel %vm2677_vm11, %v2479_v34, %v2732_v31  ;;  %v2735_v29 = vmul.f32 %v5061_v18, %v2494_v51  ;;  %vm2680_vm12 = vcmp.gt.f32.partialorder %v2494_v51, 0.0 }
 0x41c   :  { %v4052_v6 = vpop.f32.mrf.mxu0  ;;  %4148 = vmatprep.mubr.f32.mxu1 %v2780_v16 }
 0x41d   :  { %v2734_v22 = vmul.f32 %v5061_v18, %v2489_v8  ;;  %v2504_v54 = vadd.f32 %v4052_v6, %v5055_v47  ;;  %4149 = vmatmul.mubr.f32.gmra.mxu1 %v2781_v28  ;;  %vm2679_vm13 = vcmp.gt.f32.partialorder %v2489_v8, 0.0  ;;  %v2783_v0 = vsel %vm2680_vm12, %v2494_v51, %v2735_v29 }
 0x41e   :  { %v2498_v9 = vpop.f32.mrf.mxu0 }
 0x41f   :  { %v2499_v27 = vadd.f32 %v5055_v47, %v2498_v9  ;;  %v2782_v40 = vsel %vm2679_vm13, %v2489_v8, %v2734_v22  ;;  %v2737_v11 = vmul.f32 %v5061_v18, %v2504_v54  ;;  %vm2682_vm14 = vcmp.gt.f32.partialorder %v2504_v54, 0.0 }
 0x420   :  { %v4055_v12 = vpop.f32.mrf.mxu0  ;;  %4151 = vmatprep.mubr.f32.mxu1 %v2782_v40 }
 0x421   :  { %v2736_v44 = vmul.f32 %v5061_v18, %v2499_v27  ;;  %v2514_v62 = vadd.f32 %v4055_v12, %v5055_v47  ;;  %4152 = vmatmul.mubr.f32.gmra.mxu1 %v2783_v0  ;;  %vm2681_vm15 = vcmp.gt.f32.partialorder %v2499_v27, 0.0  ;;  %v2785_v42 = vsel %vm2682_vm14, %v2504_v54, %v2737_v11 }
 0x422   :  { %v2508_v41 = vpop.f32.mrf.mxu0 }
 0x423   :  { %v2509_v14 = vadd.f32 %v5055_v47, %v2508_v41  ;;  %v2784_v45 = vsel %vm2681_vm15, %v2499_v27, %v2736_v44  ;;  %v2739_v33 = vmul.f32 %v5061_v18, %v2514_v62  ;;  %vm2684_vm0 = vcmp.gt.f32.partialorder %v2514_v62, 0.0 }
 0x424   :  { %v4058_v49 = vpop.f32.mrf.mxu0  ;;  %4154 = vmatprep.mubr.f32.mxu1 %v2784_v45 }
 0x425   :  { %v2738_v24 = vmul.f32 %v5061_v18, %v2509_v14  ;;  %v2524_v19 = vadd.f32 %v4058_v49, %v5055_v47  ;;  %4155 = vmatmul.mubr.f32.gmra.mxu1 %v2785_v42  ;;  %vm2683_vm1 = vcmp.gt.f32.partialorder %v2509_v14, 0.0  ;;  %v2787_v17 = vsel %vm2684_vm0, %v2514_v62, %v2739_v33 }
 0x426   :  { %v2518_v32 = vpop.f32.mrf.mxu0 }
 0x427   :  { %v2519_v10 = vadd.f32 %v5055_v47, %v2518_v32  ;;  %v2786_v57 = vsel %vm2683_vm1, %v2509_v14, %v2738_v24  ;;  %v2741_v43 = vmul.f32 %v5061_v18, %v2524_v19  ;;  %vm2686_vm2 = vcmp.gt.f32.partialorder %v2524_v19, 0.0 }
 0x428   :  { %v4061_v52 = vpop.f32.mrf.mxu0  ;;  %4157 = vmatprep.mubr.f32.mxu1 %v2786_v57 }
 0x429   :  { %v2740_v55 = vmul.f32 %v5061_v18, %v2519_v10  ;;  %v2534_v60 = vadd.f32 %v4061_v52, %v5055_v47  ;;  %4158 = vmatmul.mubr.f32.gmra.mxu1 %v2787_v17  ;;  %vm2685_vm3 = vcmp.gt.f32.partialorder %v2519_v10, 0.0  ;;  %v2789_v23 = vsel %vm2686_vm2, %v2524_v19, %v2741_v43 }
 0x42a   :  { %v2528_v15 = vpop.f32.mrf.mxu0 }
 0x42b   :  { %v2529_v58 = vadd.f32 %v5055_v47, %v2528_v15  ;;  %v2788_v13 = vsel %vm2685_vm3, %v2519_v10, %v2740_v55  ;;  %v2743_v35 = vmul.f32 %v5061_v18, %v2534_v60  ;;  %vm2688_vm4 = vcmp.gt.f32.partialorder %v2534_v60, 0.0 }
 0x42c   :  { %v4064_v59 = vpop.f32.mrf.mxu0  ;;  %4160 = vmatprep.mubr.f32.mxu1 %v2788_v13 }
 0x42d   :  { %v2742_v30 = vmul.f32 %v5061_v18, %v2529_v58  ;;  %v2544_v1 = vadd.f32 %v4064_v59, %v5055_v47  ;;  %4161 = vmatmul.mubr.f32.gmra.mxu1 %v2789_v23  ;;  %vm2687_vm5 = vcmp.gt.f32.partialorder %v2529_v58, 0.0  ;;  %v2791_v37 = vsel %vm2688_vm4, %v2534_v60, %v2743_v35 }
 0x42e   :  { %v2538_v46 = vpop.f32.mrf.mxu0 }
 0x42f   :  { %v2539_v63 = vadd.f32 %v5055_v47, %v2538_v46  ;;  %v2790_v61 = vsel %vm2687_vm5, %v2529_v58, %v2742_v30  ;;  %v2745_v56 = vmul.f32 %v5061_v18, %v2544_v1  ;;  %vm2690_vm6 = vcmp.gt.f32.partialorder %v2544_v1, 0.0 }
 0x430   :  { %v4067_v7 = vpop.f32.mrf.mxu0  ;;  %4163 = vmatprep.mubr.f32.mxu1 %v2790_v61 }
 0x431   :  { %v2744_v21 = vmul.f32 %v5061_v18, %v2539_v63  ;;  %v2554_v2 = vadd.f32 %v4067_v7, %v5055_v47  ;;  %4164 = vmatmul.mubr.f32.gmra.mxu1 %v2791_v37  ;;  %vm2689_vm7 = vcmp.gt.f32.partialorder %v2539_v63, 0.0  ;;  %v2793_v38 = vsel %vm2690_vm6, %v2544_v1, %v2745_v56 }
 0x432   :  { %v2548_v36 = vpop.f32.mrf.mxu0 }
 0x433   :  { %v2549_v48 = vadd.f32 %v5055_v47, %v2548_v36  ;;  %v2792_v39 = vsel %vm2689_vm7, %v2539_v63, %v2744_v21  ;;  %v2747_v20 = vmul.f32 %v5061_v18, %v2554_v2  ;;  %vm2692_vm8 = vcmp.gt.f32.partialorder %v2554_v2, 0.0 }
 0x434   :  { %v4070_v4 = vpop.f32.mrf.mxu0  ;;  %4166 = vmatprep.mubr.f32.mxu1 %v2792_v39 }
 0x435   :  { %v2746_v53 = vmul.f32 %v5061_v18, %v2549_v48  ;;  %v2564_v34 = vadd.f32 %v4070_v4, %v5055_v47  ;;  %4167 = vmatmul.mubr.f32.gmra.mxu1 %v2793_v38  ;;  %vm2691_vm9 = vcmp.gt.f32.partialorder %v2549_v48, 0.0  ;;  %v2795_v51 = vsel %vm2692_vm8, %v2554_v2, %v2747_v20 }
 0x436   :  { %v2558_v25 = vpop.f32.mrf.mxu0 }
 0x437   :  { %v2559_v5 = vadd.f32 %v5055_v47, %v2558_v25  ;;  %v2794_v3 = vsel %vm2691_vm9, %v2549_v48, %v2746_v53  ;;  %v2749_v26 = vmul.f32 %v5061_v18, %v2564_v34  ;;  %vm2694_vm10 = vcmp.gt.f32.partialorder %v2564_v34, 0.0 }
 0x438   :  { %v4073_v31 = vpop.f32.mrf.mxu0  ;;  %4169 = vmatprep.mubr.f32.mxu1 %v2794_v3 }
 0x439   :  { %v2748_v50 = vmul.f32 %v5061_v18, %v2559_v5  ;;  %v2574_v8 = vadd.f32 %v4073_v31, %v5055_v47  ;;  %4170 = vmatmul.mubr.f32.gmra.mxu1 %v2795_v51  ;;  %vm2693_vm11 = vcmp.gt.f32.partialorder %v2559_v5, 0.0  ;;  %v2797_v54 = vsel %vm2694_vm10, %v2564_v34, %v2749_v26 }
 0x43a   :  { %v2568_v16 = vpop.f32.mrf.mxu0 }
 0x43b   :  { %v2569_v29 = vadd.f32 %v5055_v47, %v2568_v16  ;;  %v2796_v6 = vsel %vm2693_vm11, %v2559_v5, %v2748_v50  ;;  %v2751_v28 = vmul.f32 %v5061_v18, %v2574_v8  ;;  %vm2696_vm12 = vcmp.gt.f32.partialorder %v2574_v8, 0.0 }
 0x43c   :  { %v4076_v22 = vpop.f32.mrf.mxu0  ;;  %4172 = vmatprep.mubr.f32.mxu1 %v2796_v6 }
 0x43d   :  { %v2750_v9 = vmul.f32 %v5061_v18, %v2569_v29  ;;  %v2584_v27 = vadd.f32 %v4076_v22, %v5055_v47  ;;  %4173 = vmatmul.mubr.f32.gmra.mxu1 %v2797_v54  ;;  %vm2695_vm13 = vcmp.gt.f32.partialorder %v2569_v29, 0.0  ;;  %v2799_v62 = vsel %vm2696_vm12, %v2574_v8, %v2751_v28 }
 0x43e   :  { %v2578_v40 = vpop.f32.mrf.mxu0 }
 0x43f   :  { %v2579_v11 = vadd.f32 %v5055_v47, %v2578_v40  ;;  %v2798_v12 = vsel %vm2695_vm13, %v2569_v29, %v2750_v9  ;;  %v2753_v0 = vmul.f32 %v5061_v18, %v2584_v27  ;;  %vm2698_vm14 = vcmp.gt.f32.partialorder %v2584_v27, 0.0 }
 0x440   :  { %v4079_v44 = vpop.f32.mrf.mxu0  ;;  %4175 = vmatprep.mubr.f32.mxu1 %v2798_v12 }
 0x441   :  { %v2752_v41 = vmul.f32 %v5061_v18, %v2579_v11  ;;  %v2594_v14 = vadd.f32 %v4079_v44, %v5055_v47  ;;  %4176 = vmatmul.mubr.f32.gmra.mxu1 %v2799_v62  ;;  %vm2697_vm15 = vcmp.gt.f32.partialorder %v2579_v11, 0.0  ;;  %v2801_v19 = vsel %vm2698_vm14, %v2584_v27, %v2753_v0 }
 0x442   :  { %v2588_v45 = vpop.f32.mrf.mxu0 }
 0x443   :  { %v2589_v33 = vadd.f32 %v5055_v47, %v2588_v45  ;;  %v2800_v49 = vsel %vm2697_vm15, %v2579_v11, %v2752_v41  ;;  %v2755_v42 = vmul.f32 %v5061_v18, %v2594_v14  ;;  %vm2700_vm0 = vcmp.gt.f32.partialorder %v2594_v14, 0.0 }
 0x444   :  { %v4082_v24 = vpop.f32.mrf.mxu0  ;;  %4178 = vmatprep.mubr.f32.mxu1 %v2800_v49  ;;  %v5161_v49 = vld [vmem:[%s5226_s9] ss:$0 sm:$0xff]  ;;  %s4518_s9 = smov [#allocation14]  }
 0x445   :  { %v2754_v32 = vmul.f32 %v5061_v18, %v2589_v33  ;;  %v2604_v10 = vadd.f32 %v4082_v24, %v5055_v47  ;;  %4179 = vmatmul.mubr.f32.gmra.mxu1 %v2801_v19  ;;  %vm2699_vm1 = vcmp.gt.f32.partialorder %v2589_v33, 0.0  ;;  %v2803_v60 = vsel %vm2700_vm0, %v2594_v14, %v2755_v42  ;;  %s3199_s29 = sshll.u32 %s4518_s9, 4  ;;  %s3200_s29 = int_to_ptr.vmem [resolvable:$true] %s3199_s29 }
 0x446   :  { %v2598_v57 = vpop.f32.mrf.mxu0  ;;  %s4475_s30 = scalar_lea.vmem %s3200_s29, 6144  ;;  %p4480_p3 = scmp.lt.s32.totalorder %s3200_s29, %s3200_s29 }
 0x447   :  { %v2599_v43 = vadd.f32 %v5055_v47, %v2598_v57  ;;  %v2802_v52 = vsel %vm2699_vm1, %v2589_v33, %v2754_v32  ;;  %v2757_v17 = vmul.f32 %v5061_v18, %v2604_v10  ;;  %vm2702_vm2 = vcmp.gt.f32.partialorder %v2604_v10, 0.0  ;;  %p4476_p2 = scmp.ne.s32.totalorder %s3200_s29, %s4475_s30  ;;  %p4481_p4 = scmp.lt.s32.totalorder %s4475_s30, %s4475_s30 }
 0x448   :  { %v4085_v55 = vpop.f32.mrf.mxu0  ;;  %4181 = vmatprep.mubr.f32.mxu1 %v2802_v52 }
 0x449   :  { %v2756_v15 = vmul.f32 %v5061_v18, %v2599_v43  ;;  %v2614_v58 = vadd.f32 %v4085_v55, %v5055_v47  ;;  %4182 = vmatmul.mubr.f32.gmra.mxu1 %v2803_v60  ;;  %vm2701_vm3 = vcmp.gt.f32.partialorder %v2599_v43, 0.0  ;;  %v2805_v1 = vsel %vm2702_vm2, %v2604_v10, %v2757_v17  ;;  %p4482_p5 = por %p4481_p4, %p4480_p3 }
 0x44a   :  { %v2608_v13 = vpop.f32.mrf.mxu0 }
 0x44b   :  { %v2609_v35 = vadd.f32 %v5055_v47, %v2608_v13  ;;  %v2804_v59 = vsel %vm2701_vm3, %v2599_v43, %v2756_v15  ;;  %v2759_v23 = vmul.f32 %v5061_v18, %v2614_v58  ;;  %vm2704_vm4 = vcmp.gt.f32.partialorder %v2614_v58, 0.0  ;;  %p4483_p6 = pnand %p4482_p5, %p4476_p2 }
 0x44c   :  { %v4088_v30 = vpop.f32.mrf.mxu0  ;;  %4184 = vmatprep.mubr.f32.mxu1 %v2804_v59 }
 0x44d   :  { %v2758_v46 = vmul.f32 %v5061_v18, %v2609_v35  ;;  %v2624_v63 = vadd.f32 %v4088_v30, %v5055_v47  ;;  %4185 = vmatmul.mubr.f32.gmra.mxu1 %v2805_v1  ;;  %vm2703_vm5 = vcmp.gt.f32.partialorder %v2609_v35, 0.0  ;;  %v2807_v2 = vsel %vm2704_vm4, %v2614_v58, %v2759_v23 }
 0x44e   :  { %v2618_v61 = vpop.f32.mrf.mxu0 }
 0x44f   :  { %v2619_v56 = vadd.f32 %v5055_v47, %v2618_v61  ;;  %v2806_v7 = vsel %vm2703_vm5, %v2609_v35, %v2758_v46  ;;  %v2761_v37 = vmul.f32 %v5061_v18, %v2624_v63  ;;  %vm2706_vm6 = vcmp.gt.f32.partialorder %v2624_v63, 0.0 }
 0x450   :  { %v4091_v21 = vpop.f32.mrf.mxu0  ;;  %4187 = vmatprep.mubr.f32.mxu1 %v2806_v7 }
 0x451   :  { %v2760_v36 = vmul.f32 %v5061_v18, %v2619_v56  ;;  %v2634_v48 = vadd.f32 %v4091_v21, %v5055_v47  ;;  %4188 = vmatmul.mubr.f32.gmra.mxu1 %v2807_v2  ;;  %vm2705_vm7 = vcmp.gt.f32.partialorder %v2619_v56, 0.0  ;;  %v2809_v34 = vsel %vm2706_vm6, %v2624_v63, %v2761_v37 }
 0x452   :  { %v2628_v39 = vpop.f32.mrf.mxu0 }
 0x453   :  { %v2629_v20 = vadd.f32 %v5055_v47, %v2628_v39  ;;  %v2808_v4 = vsel %vm2705_vm7, %v2619_v56, %v2760_v36  ;;  %v2763_v38 = vmul.f32 %v5061_v18, %v2634_v48  ;;  %vm2708_vm8 = vcmp.gt.f32.partialorder %v2634_v48, 0.0 }
 0x454   :  { %v4094_v53 = vpop.f32.mrf.mxu0  ;;  %4190 = vmatprep.mubr.f32.mxu1 %v2808_v4 }
 0x455   :  { %v2762_v25 = vmul.f32 %v5061_v18, %v2629_v20  ;;  %v2644_v5 = vadd.f32 %v4094_v53, %v5055_v47  ;;  %4191 = vmatmul.mubr.f32.gmra.mxu1 %v2809_v34  ;;  %vm2707_vm9 = vcmp.gt.f32.partialorder %v2629_v20, 0.0  ;;  %v2811_v8 = vsel %vm2708_vm8, %v2634_v48, %v2763_v38 }
 0x456   :  { %v2638_v3 = vpop.f32.mrf.mxu0 }
 0x457   :  { %v2639_v26 = vadd.f32 %v5055_v47, %v2638_v3  ;;  %v2810_v31 = vsel %vm2707_vm9, %v2629_v20, %v2762_v25  ;;  %v2765_v51 = vmul.f32 %v5061_v18, %v2644_v5  ;;  %vm2710_vm10 = vcmp.gt.f32.partialorder %v2644_v5, 0.0 }
 0x458   :  { %v4097_v50 = vpop.f32.mrf.mxu0  ;;  %4193 = vmatprep.mubr.f32.mxu1 %v2810_v31 }
 0x459   :  { %v2764_v16 = vmul.f32 %v5061_v18, %v2639_v26  ;;  %v2654_v29 = vadd.f32 %v4097_v50, %v5055_v47  ;;  %4194 = vmatmul.mubr.f32.gmra.mxu1 %v2811_v8  ;;  %vm2709_vm11 = vcmp.gt.f32.partialorder %v2639_v26, 0.0  ;;  %v2813_v27 = vsel %vm2710_vm10, %v2644_v5, %v2765_v51 }
 0x45a   :  { %v2648_v6 = vpop.f32.mrf.mxu0 }
 0x45b   :  { %v2649_v28 = vadd.f32 %v5055_v47, %v2648_v6  ;;  %v2812_v22 = vsel %vm2709_vm11, %v2639_v26, %v2764_v16  ;;  %v2767_v54 = vmul.f32 %v5061_v18, %v2654_v29  ;;  %vm2712_vm12 = vcmp.gt.f32.partialorder %v2654_v29, 0.0 }
 0x45c   :  { %v4100_v9 = vpop.f32.mrf.mxu0  ;;  %4196 = vmatprep.mubr.f32.mxu1 %v2812_v22 }
 0x45d   :  { %v2766_v40 = vmul.f32 %v5061_v18, %v2649_v28  ;;  %v2664_v11 = vadd.f32 %v4100_v9, %v5055_v47  ;;  %4197 = vmatmul.mubr.f32.gmra.mxu1 %v2813_v27  ;;  %vm2711_vm13 = vcmp.gt.f32.partialorder %v2649_v28, 0.0  ;;  %v2815_v41 = vsel %vm2712_vm12, %v2654_v29, %v2767_v54 }
 0x45e   :  { %v2658_v12 = vpop.f32.mrf.mxu0 }
 0x45f   :  { %v2659_v0 = vadd.f32 %v5055_v47, %v2658_v12  ;;  %v2814_v44 = vsel %vm2711_vm13, %v2649_v28, %v2766_v40  ;;  %v2769_v62 = vmul.f32 %v5061_v18, %v2664_v11  ;;  %vm2714_vm14 = vcmp.gt.f32.partialorder %v2664_v11, 0.0 }
 0x460   :  { %4199 = vmatprep.mubr.f32.mxu1 %v2814_v44 }
 0x461   :  { %v2768_v14 = vmul.f32 %v5061_v18, %v2659_v0  ;;  %4200 = vmatmul.mubr.f32.gmra.mxu1 %v2815_v41  ;;  %vm2713_vm15 = vcmp.gt.f32.partialorder %v2659_v0, 0.0  ;;  %v2817_v33 = vsel %vm2714_vm14, %v2664_v11, %v2769_v62 }
 0x463   :  { %v2816_v45 = vsel %vm2713_vm15, %v2659_v0, %v2768_v14 }
 0x464   :  { %4202 = vmatprep.mubr.f32.mxu1 %v2816_v45 }
 0x465   :  { %4203 = vmatmul.mubr.f32.gmra.mxu1 %v2817_v33 }
 0x4c9   :  { %v4135_v47 = vpop.f32.mrf.mxu1 }
 0x4ca   :  { %v2913_v42 = vadd.f32 %v4135_v47, %v5161_v49 }
 0x4cb   :  { %v2907_v24 = vpop.f32.mrf.mxu1 }
 0x4cc   :  { %3147 = vst [vmem:[#allocation14 + $0x8] sm:$0xff] %v2913_v42  ;;  %v2908_v19 = vadd.f32 %v5161_v49, %v2907_v24 }
 0x4cd   :  { %v4138_v32 = vpop.f32.mrf.mxu1 }
 0x4ce   :  { %3146 = vst [vmem:[#allocation14] sm:$0xff] %v2908_v19  ;;  %v2923_v18 = vadd.f32 %v4138_v32, %v5161_v49 }
 0x4cf   :  { %v2917_v10 = vpop.f32.mrf.mxu1 }
 0x4d0   :  { %3149 = vst [vmem:[#allocation14 + $0x18] sm:$0xff] %v2923_v18  ;;  %v2918_v57 = vadd.f32 %v5161_v49, %v2917_v10 }
 0x4d1   :  { %v4141_v43 = vpop.f32.mrf.mxu1 }
 0x4d2   :  { %3148 = vst [vmem:[#allocation14 + $0x10] sm:$0xff] %v2918_v57  ;;  %v2933_v52 = vadd.f32 %v4141_v43, %v5161_v49 }
 0x4d3   :  { %v2927_v17 = vpop.f32.mrf.mxu1 }
 0x4d4   :  { %3151 = vst [vmem:[#allocation14 + $0x28] sm:$0xff] %v2933_v52  ;;  %v2928_v55 = vadd.f32 %v5161_v49, %v2927_v17 }
 0x4d5   :  { %v4144_v60 = vpop.f32.mrf.mxu1 }
 0x4d6   :  { %3150 = vst [vmem:[#allocation14 + $0x20] sm:$0xff] %v2928_v55  ;;  %v2943_v15 = vadd.f32 %v4144_v60, %v5161_v49 }
 0x4d7   :  { %v2937_v58 = vpop.f32.mrf.mxu1 }
 0x4d8   :  { %3153 = vst [vmem:[#allocation14 + $0x38] sm:$0xff] %v2943_v15  ;;  %v2938_v13 = vadd.f32 %v5161_v49, %v2937_v58 }
 0x4d9   :  { %v4147_v35 = vpop.f32.mrf.mxu1 }
 0x4da   :  { %3152 = vst [vmem:[#allocation14 + $0x30] sm:$0xff] %v2938_v13  ;;  %v2953_v59 = vadd.f32 %v4147_v35, %v5161_v49 }
 0x4db   :  { %v2947_v23 = vpop.f32.mrf.mxu1 }
 0x4dc   :  { %3155 = vst [vmem:[#allocation14 + $0x48] sm:$0xff] %v2953_v59  ;;  %v2948_v30 = vadd.f32 %v5161_v49, %v2947_v23 }
 0x4dd   :  { %v4150_v1 = vpop.f32.mrf.mxu1 }
 0x4de   :  { %3154 = vst [vmem:[#allocation14 + $0x40] sm:$0xff] %v2948_v30  ;;  %v2963_v46 = vadd.f32 %v4150_v1, %v5161_v49 }
 0x4df   :  { %v2957_v63 = vpop.f32.mrf.mxu1 }
 0x4e0   :  { %3157 = vst [vmem:[#allocation14 + $0x58] sm:$0xff] %v2963_v46  ;;  %v2958_v61 = vadd.f32 %v5161_v49, %v2957_v63 }
 0x4e1   :  { %v4153_v56 = vpop.f32.mrf.mxu1 }
 0x4e2   :  { %3156 = vst [vmem:[#allocation14 + $0x50] sm:$0xff] %v2958_v61  ;;  %v2973_v7 = vadd.f32 %v4153_v56, %v5161_v49 }
 0x4e3   :  { %v2967_v37 = vpop.f32.mrf.mxu1 }
 0x4e4   :  { %3159 = vst [vmem:[#allocation14 + $0x68] sm:$0xff] %v2973_v7  ;;  %v2968_v21 = vadd.f32 %v5161_v49, %v2967_v37 }
 0x4e5   :  { %v4156_v2 = vpop.f32.mrf.mxu1 }
 0x4e6   :  { %3158 = vst [vmem:[#allocation14 + $0x60] sm:$0xff] %v2968_v21  ;;  %v2983_v36 = vadd.f32 %v4156_v2, %v5161_v49 }
 0x4e7   :  { %v2977_v48 = vpop.f32.mrf.mxu1 }
 0x4e8   :  { %3161 = vst [vmem:[#allocation14 + $0x78] sm:$0xff] %v2983_v36  ;;  %v2978_v39 = vadd.f32 %v5161_v49, %v2977_v48 }
 0x4e9   :  { %v4159_v20 = vpop.f32.mrf.mxu1 }
 0x4ea   :  { %3160 = vst [vmem:[#allocation14 + $0x70] sm:$0xff] %v2978_v39  ;;  %v2993_v4 = vadd.f32 %v4159_v20, %v5161_v49 }
 0x4eb   :  { %v2987_v38 = vpop.f32.mrf.mxu1 }
 0x4ec   :  { %3163 = vst [vmem:[#allocation14 + $0x88] sm:$0xff] %v2993_v4  ;;  %v2988_v53 = vadd.f32 %v5161_v49, %v2987_v38 }
 0x4ed   :  { %v4162_v34 = vpop.f32.mrf.mxu1 }
 0x4ee   :  { %3162 = vst [vmem:[#allocation14 + $0x80] sm:$0xff] %v2988_v53  ;;  %v3003_v25 = vadd.f32 %v4162_v34, %v5161_v49 }
 0x4ef   :  { %v2997_v5 = vpop.f32.mrf.mxu1 }
 0x4f0   :  { %3165 = vst [vmem:[#allocation14 + $0x98] sm:$0xff] %v3003_v25  ;;  %v2998_v3 = vadd.f32 %v5161_v49, %v2997_v5 }
 0x4f1   :  { %v4165_v26 = vpop.f32.mrf.mxu1 }
 0x4f2   :  { %3164 = vst [vmem:[#allocation14 + $0x90] sm:$0xff] %v2998_v3  ;;  %v3013_v31 = vadd.f32 %v4165_v26, %v5161_v49 }
 0x4f3   :  { %v3007_v51 = vpop.f32.mrf.mxu1 }
 0x4f4   :  { %3167 = vst [vmem:[#allocation14 + $0xa8] sm:$0xff] %v3013_v31  ;;  %v3008_v50 = vadd.f32 %v5161_v49, %v3007_v51 }
 0x4f5   :  { %v4168_v8 = vpop.f32.mrf.mxu1 }
 0x4f6   :  { %3166 = vst [vmem:[#allocation14 + $0xa0] sm:$0xff] %v3008_v50  ;;  %v3023_v16 = vadd.f32 %v4168_v8, %v5161_v49 }
 0x4f7   :  { %v3017_v29 = vpop.f32.mrf.mxu1 }
 0x4f8   :  { %3169 = vst [vmem:[#allocation14 + $0xb8] sm:$0xff] %v3023_v16  ;;  %v3018_v6 = vadd.f32 %v5161_v49, %v3017_v29 }
 0x4f9   :  { %v4171_v28 = vpop.f32.mrf.mxu1 }
 0x4fa   :  { %3168 = vst [vmem:[#allocation14 + $0xb0] sm:$0xff] %v3018_v6  ;;  %v3033_v22 = vadd.f32 %v4171_v28, %v5161_v49 }
 0x4fb   :  { %v3027_v54 = vpop.f32.mrf.mxu1 }
 0x4fc   :  { %3171 = vst [vmem:[#allocation14 + $0xc8] sm:$0xff] %v3033_v22  ;;  %v3028_v9 = vadd.f32 %v5161_v49, %v3027_v54 }
 0x4fd   :  { %v4174_v27 = vpop.f32.mrf.mxu1 }
 0x4fe   :  { %3170 = vst [vmem:[#allocation14 + $0xc0] sm:$0xff] %v3028_v9  ;;  %v3043_v40 = vadd.f32 %v4174_v27, %v5161_v49 }
 0x4ff   :  { %v3037_v11 = vpop.f32.mrf.mxu1 }
 0x500   :  { %3173 = vst [vmem:[#allocation14 + $0xd8] sm:$0xff] %v3043_v40  ;;  %v3038_v12 = vadd.f32 %v5161_v49, %v3037_v11 }
 0x501   :  { %v4177_v0 = vpop.f32.mrf.mxu1 }
 0x502   :  { %3172 = vst [vmem:[#allocation14 + $0xd0] sm:$0xff] %v3038_v12  ;;  %v3053_v44 = vadd.f32 %v4177_v0, %v5161_v49 }
 0x503   :  { %v3047_v62 = vpop.f32.mrf.mxu1 }
 0x504   :  { %3175 = vst [vmem:[#allocation14 + $0xe8] sm:$0xff] %v3053_v44  ;;  %v3048_v41 = vadd.f32 %v5161_v49, %v3047_v62 }
 0x505   :  { %v4180_v14 = vpop.f32.mrf.mxu1 }
 0x506   :  { %3174 = vst [vmem:[#allocation14 + $0xe0] sm:$0xff] %v3048_v41  ;;  %v3063_v45 = vadd.f32 %v4180_v14, %v5161_v49 }
 0x507   :  { %v3057_v33 = vpop.f32.mrf.mxu1 }
 0x508   :  { %3177 = vst [vmem:[#allocation14 + $0xf8] sm:$0xff] %v3063_v45  ;;  %v3058_v47 = vadd.f32 %v5161_v49, %v3057_v33 }
 0x509   :  { %v4183_v42 = vpop.f32.mrf.mxu1 }
 0x50a   :  { %3176 = vst [vmem:[#allocation14 + $0xf0] sm:$0xff] %v3058_v47  ;;  %v3073_v24 = vadd.f32 %v4183_v42, %v5161_v49 }
 0x50b   :  { %v3067_v19 = vpop.f32.mrf.mxu1 }
 0x50c   :  { %3179 = vst [vmem:[#allocation14 + $0x108] sm:$0xff] %v3073_v24  ;;  %v3068_v32 = vadd.f32 %v5161_v49, %v3067_v19 }
 0x50d   :  { %v4186_v18 = vpop.f32.mrf.mxu1 }
 0x50e   :  { %3178 = vst [vmem:[#allocation14 + $0x100] sm:$0xff] %v3068_v32  ;;  %v3083_v10 = vadd.f32 %v4186_v18, %v5161_v49 }
 0x50f   :  { %v3077_v57 = vpop.f32.mrf.mxu1 }
 0x510   :  { %3181 = vst [vmem:[#allocation14 + $0x118] sm:$0xff] %v3083_v10  ;;  %v3078_v43 = vadd.f32 %v5161_v49, %v3077_v57 }
 0x511   :  { %v4189_v52 = vpop.f32.mrf.mxu1 }
 0x512   :  { %3180 = vst [vmem:[#allocation14 + $0x110] sm:$0xff] %v3078_v43  ;;  %v3093_v17 = vadd.f32 %v4189_v52, %v5161_v49 }
 0x513   :  { %v3087_v55 = vpop.f32.mrf.mxu1 }
 0x514   :  { %3183 = vst [vmem:[#allocation14 + $0x128] sm:$0xff] %v3093_v17  ;;  %v3088_v60 = vadd.f32 %v5161_v49, %v3087_v55 }
 0x515   :  { %v4192_v15 = vpop.f32.mrf.mxu1 }
 0x516   :  { %3182 = vst [vmem:[#allocation14 + $0x120] sm:$0xff] %v3088_v60  ;;  %v3103_v58 = vadd.f32 %v4192_v15, %v5161_v49 }
 0x517   :  { %v3097_v13 = vpop.f32.mrf.mxu1 }
 0x518   :  { %3185 = vst [vmem:[#allocation14 + $0x138] sm:$0xff] %v3103_v58  ;;  %v3098_v35 = vadd.f32 %v5161_v49, %v3097_v13 }
 0x519   :  { %v4195_v59 = vpop.f32.mrf.mxu1 }
 0x51a   :  { %3184 = vst [vmem:[#allocation14 + $0x130] sm:$0xff] %v3098_v35  ;;  %v3113_v23 = vadd.f32 %v4195_v59, %v5161_v49 }
 0x51b   :  { %v3107_v30 = vpop.f32.mrf.mxu1 }
 0x51c   :  { %3187 = vst [vmem:[#allocation14 + $0x148] sm:$0xff] %v3113_v23  ;;  %v3108_v1 = vadd.f32 %v5161_v49, %v3107_v30 }
 0x51d   :  { %v4198_v46 = vpop.f32.mrf.mxu1 }
 0x51e   :  { %3186 = vst [vmem:[#allocation14 + $0x140] sm:$0xff] %v3108_v1  ;;  %v3123_v63 = vadd.f32 %v4198_v46, %v5161_v49 }
 0x51f   :  { %v3117_v61 = vpop.f32.mrf.mxu1 }
 0x520   :  { %3189 = vst [vmem:[#allocation14 + $0x158] sm:$0xff] %v3123_v63  ;;  %v3118_v56 = vadd.f32 %v5161_v49, %v3117_v61 }
 0x521   :  { %v4201_v7 = vpop.f32.mrf.mxu1 }
 0x522   :  { %3188 = vst [vmem:[#allocation14 + $0x150] sm:$0xff] %v3118_v56  ;;  %v3133_v37 = vadd.f32 %v4201_v7, %v5161_v49 }
 0x523   :  { %v3127_v21 = vpop.f32.mrf.mxu1 }
 0x524   :  { %3191 = vst [vmem:[#allocation14 + $0x168] sm:$0xff] %v3133_v37  ;;  %v3128_v2 = vadd.f32 %v5161_v49, %v3127_v21 }
 0x525   :  { %v4204_v36 = vpop.f32.mrf.mxu1 }
 0x526   :  { %3190 = vst [vmem:[#allocation14 + $0x160] sm:$0xff] %v3128_v2  ;;  %v3143_v48 = vadd.f32 %v4204_v36, %v5161_v49 }
 0x527   :  { %v3137_v39 = vpop.f32.mrf.mxu1 }
 0x528   :  { %3193 = vst [vmem:[#allocation14 + $0x178] sm:$0xff] %v3143_v48  ;;  %v3138_v20 = vadd.f32 %v5161_v49, %v3137_v39 }
 0x52a   :  { %3192 = vst [vmem:[#allocation14 + $0x170] sm:$0xff] %v3138_v20 }
 0x52b   :  { %4486 = shalt.err (!%p4483_p6)
}
 0x52c   :  { %3205 = dma.vmem_to_hbm [thread:$0]  %s3200_s29, 6144, %s5227_s10, [#allocation5], %s4510_s25, %s4510_s25, %s4511_s26  }
 0x52d   :  { %4503 = dma.done.wait [#allocation5], 6144  }
 0x52e   :  { %4504 = vsyncadd [#allocation5], 4294961152 }
 0x52f   :  { %3209 = vsyncpa [#allocation4], 1 }
 0x530   :  { %3210 = vsyncpa [#allocation7], 1 }
 0x531   :  { %3211 = vsyncpa [#allocation10], 1 }
 0x532   :  { %3212 = vsyncpa [#allocation13], 1 }
 0x533   :  { %3213 = vsyncpa [#allocation5], 1 }

</bundles_post_ra>
